<compile_context>
chip_gen: v7x
topology: tpu7x:2x2x1
jax: 0.10.0
libtpu: 0.0.40
codegen_flags: <defaults>
</compile_context>

<pallas_src>
import numpy as np
import jax
import jax.numpy as jnp
from jax.experimental import pallas as pl
from jax.experimental.pallas import tpu as pltpu

# --- small config consistent with the module ---
VOCAB = 16
EMB   = 8
HID   = 32
BATCH = 2
ENC_T = 8
DEC_T = 8
LANE  = 128          # lane-dense padded width for the logits store


def attention_seq2seq_kernel(enc_x_ref, dec_x_ref,
                             wih_e_ref, whh_e_ref, b_e_ref,
                             wih_d_ref, whh_d_ref, b_d_ref,
                             wout_dec_ref, wout_ctx_ref, bias_ref,
                             out_ref, attn_ref):
    # ---- hoist recurrent weights into locals ----
    whh_e = whh_e_ref[...]
    whh_d = whh_d_ref[...]

    # ---- precompute x @ W_ih + b for ALL timesteps (time-major, flat) ----
    # enc_x / dec_x are (T*B, EMB) with row index t*B + b.
    enc_xg = jnp.dot(enc_x_ref[...], wih_e_ref[...],
                     preferred_element_type=jnp.float32) + b_e_ref[...]   # (ENC_T*B, 4H)
    dec_xg = jnp.dot(dec_x_ref[...], wih_d_ref[...],
                     preferred_element_type=jnp.float32) + b_d_ref[...]   # (DEC_T*B, 4H)

    def cell(xg_t, h, c, whh):
        # PyTorch LSTM cell, gate order i, f, g, o; only h @ W_hh is serial.
        gates = xg_t + jnp.dot(h, whh, preferred_element_type=jnp.float32)  # (B, 4H)
        sg = jax.nn.sigmoid(gates)            # ONE EUP pass; covers i, f, o lanes
        i = sg[:, 0 * HID:1 * HID]
        f = sg[:, 1 * HID:2 * HID]
        o = sg[:, 3 * HID:4 * HID]
        g = jnp.tanh(gates[:, 2 * HID:3 * HID])
        c_new = f * c + i * g
        h_new = o * jnp.tanh(c_new)
        return h_new, c_new

    h = jnp.zeros((BATCH, HID), jnp.float32)
    c = jnp.zeros((BATCH, HID), jnp.float32)

    # ---- encoder LSTM (statically unrolled); h history kept in vregs ----
    enc_hs = []
    for t in range(ENC_T):
        h, c = cell(enc_xg[t * BATCH:(t + 1) * BATCH, :], h, c, whh_e)
        enc_hs.append(h)

    # ---- decoder LSTM (statically unrolled); attention is NOT in this loop ----
    dec_hs = []
    for t in range(DEC_T):
        h, c = cell(dec_xg[t * BATCH:(t + 1) * BATCH, :], h, c, whh_d)
        dec_hs.append(h)

    enc_flat = jnp.concatenate(enc_hs, axis=0)      # (ENC_T*B, H), row = t*B + b
    dec_flat = jnp.concatenate(dec_hs, axis=0)      # (DEC_T*B, H), row = d*B + b

    # ---- batched dot-product attention as flat 2D matmuls ----
    # scores[r, c] = <dec_flat[r], enc_flat[c]>; additive bias masks out
    # column batch != row batch (-1e30), so the softmax over the 16 lanes is
    # exactly the per-batch softmax over ENC_T encoder steps.
    scores = jax.lax.dot_general(dec_flat, enc_flat,
                                 (((1,), (1,)), ((), ())),
                                 preferred_element_type=jnp.float32)       # (DEC_T*B, ENC_T*B)
    scores = scores + bias_ref[...]
    m = jnp.max(scores, axis=-1, keepdims=True)
    e = jnp.exp(scores - m)
    w = e * pl.reciprocal(jnp.sum(e, axis=-1, keepdims=True))              # exact reciprocal
    attn_ref[...] = w                                                      # (DEC_T*B, ENC_T*B)

    # context[r, h] = sum_c w[r, c] * enc_flat[c, h]  (masked cols are 0)
    context = jnp.dot(w, enc_flat, preferred_element_type=jnp.float32)     # (DEC_T*B, H)

    # ---- output projection: no lane concat, lane-dense 128-wide slab store ----
    out_ref[...] = (jnp.dot(dec_flat, wout_dec_ref[...], preferred_element_type=jnp.float32)
                    + jnp.dot(context, wout_ctx_ref[...], preferred_element_type=jnp.float32))


def ger2eng_attention_forward(params, enc_ids, dec_ids):
    emb = params["emb"]
    # Embedding lookup + time-major flatten stay in the wrapper
    # (trivial XLA gather / layout plumbing at this size).
    enc_x = emb[enc_ids].astype(jnp.float32).transpose(1, 0, 2).reshape(ENC_T * BATCH, EMB)
    dec_x = emb[dec_ids].astype(jnp.float32).transpose(1, 0, 2).reshape(DEC_T * BATCH, EMB)

    # Zero-pad the output projection to 128 lanes, split into h / context halves.
    wout_dec = jnp.zeros((HID, LANE), jnp.float32).at[:, :VOCAB].set(params["wout_t"][:HID])
    wout_ctx = jnp.zeros((HID, LANE), jnp.float32).at[:, :VOCAB].set(params["wout_t"][HID:])

    # Constant additive mask: row r = d*B + b may only attend to cols c = t*B + b.
    rb = jnp.arange(DEC_T * BATCH)[:, None] % BATCH
    cb = jnp.arange(ENC_T * BATCH)[None, :] % BATCH
    attn_bias = jnp.where(rb == cb, 0.0, -1e30).astype(jnp.float32)

    vmem = pl.BlockSpec(memory_space=pltpu.MemorySpace.VMEM)
    logits_pad, attn_full = pl.pallas_call(
        attention_seq2seq_kernel,
        out_shape=(jax.ShapeDtypeStruct((DEC_T * BATCH, LANE), jnp.float32),
                   jax.ShapeDtypeStruct((DEC_T * BATCH, ENC_T * BATCH), jnp.float32)),
        in_specs=[vmem] * 11,
        out_specs=(vmem, vmem),
    )(enc_x, dec_x,
      params["wih_e_t"], params["whh_e_t"], params["b_e"],
      params["wih_d_t"], params["whh_d_t"], params["b_d"],
      wout_dec, wout_ctx, attn_bias)

    # logits: (DEC_T*B, 128) -> (B, DEC_T, VOCAB)
    logits = logits_pad.reshape(DEC_T, BATCH, LANE)[:, :, :VOCAB].transpose(1, 0, 2)
    # attention: pick the matching-batch diagonal -> (DEC_T, B, ENC_T)
    w4 = attn_full.reshape(DEC_T, BATCH, ENC_T, BATCH)
    bidx = jnp.arange(BATCH)
    attn_weights = jnp.transpose(w4[:, bidx, :, bidx], (1, 0, 2))
    return logits, attn_weights


# ------------------------- pure-JAX reference -------------------------
def reference_forward(params, enc_ids, dec_ids):
    emb = params["emb"]
    enc = jnp.transpose(emb[enc_ids], (1, 0, 2))         # (ENC_T, B, EMB)
    dec = jnp.transpose(emb[dec_ids], (1, 0, 2))         # (DEC_T, B, EMB)

    def step(x, h, c, wih_t, whh_t, b):
        g = x @ wih_t + h @ whh_t + b
        i = jax.nn.sigmoid(g[:, 0 * HID:1 * HID])
        f = jax.nn.sigmoid(g[:, 1 * HID:2 * HID])
        gg = jnp.tanh(g[:, 2 * HID:3 * HID])
        o = jax.nn.sigmoid(g[:, 3 * HID:4 * HID])
        c = f * c + i * gg
        h = o * jnp.tanh(c)
        return h, c

    h = jnp.zeros((BATCH, HID), jnp.float32)
    c = jnp.zeros((BATCH, HID), jnp.float32)
    enc_out = []
    for t in range(ENC_T):
        h, c = step(enc[t], h, c, params["wih_e_t"], params["whh_e_t"], params["b_e"])
        enc_out.append(h)
    enc_out = jnp.stack(enc_out)                         # (ENC_T, B, H)

    logits, attns = [], []
    for i in range(DEC_T):
        h, c = step(dec[i], h, c, params["wih_d_t"], params["whh_d_t"], params["b_d"])
        scores = jnp.einsum("tbh,bh->bt", enc_out, h)    # (B, ENC_T)
        w = jax.nn.softmax(scores, axis=-1)
        attns.append(w)
        attn_value = jnp.einsum("bt,tbh->bh", w, enc_out)
        resp = jnp.concatenate([h, attn_value], axis=-1)
        logits.append(resp @ params["wout_t"])
    logits = jnp.transpose(jnp.stack(logits), (1, 0, 2))  # (B, DEC_T, VOCAB)
    return logits, jnp.stack(attns)                       # (DEC_T, B, ENC_T)


def init_params(key):
    ks = jax.random.split(key, 8)
    s = 0.1
    return {
        "emb":     jax.random.normal(ks[0], (VOCAB, EMB), jnp.float32),
        # PyTorch LSTM weights are (4H, in); pre-transposed for x @ W.T
        "wih_e_t": s * jax.random.normal(ks[1], (EMB, 4 * HID), jnp.float32),
        "whh_e_t": s * jax.random.normal(ks[2], (HID, 4 * HID), jnp.float32),
        "b_e":     s * jax.random.normal(ks[3], (1, 4 * HID), jnp.float32),  # b_ih + b_hh folded
        "wih_d_t": s * jax.random.normal(ks[4], (EMB, 4 * HID), jnp.float32),
        "whh_d_t": s * jax.random.normal(ks[5], (HID, 4 * HID), jnp.float32),
        "b_d":     s * jax.random.normal(ks[6], (1, 4 * HID), jnp.float32),
        # nn.Linear(2H, vocab, bias=False) weight (vocab, 2H) -> pre-transposed
        "wout_t":  s * jax.random.normal(ks[7], (2 * HID, VOCAB), jnp.float32),
    }


if __name__ == "__main__":
    key = jax.random.PRNGKey(0)
    params = init_params(key)

    k1, k2 = jax.random.split(jax.random.PRNGKey(1))
    enc_ids = jax.random.randint(k1, (BATCH, ENC_T), 0, VOCAB, dtype=jnp.int32)
    dec_ids = jax.random.randint(k2, (BATCH, DEC_T), 0, VOCAB, dtype=jnp.int32)

    logits, attn = jax.jit(ger2eng_attention_forward)(params, enc_ids, dec_ids)
    jax.block_until_ready((logits, attn))

    ref_logits, ref_attn = reference_forward(params, enc_ids, dec_ids)
    np.testing.assert_allclose(np.asarray(logits), np.asarray(ref_logits),
                               rtol=1e-4, atol=1e-4)
    np.testing.assert_allclose(np.asarray(attn), np.asarray(ref_attn),
                               rtol=1e-4, atol=1e-4)

    print("KERNEL_OK")
</pallas_src>

<mosaic_0001>
module attributes {stable_mosaic.version = 11 : i64} {
  func.func @attention_seq2seq_kernel(%arg0: memref<16x8xf32, #tpu.memory_space<vmem>>, %arg1: memref<16x8xf32, #tpu.memory_space<vmem>>, %arg2: memref<8x128xf32, #tpu.memory_space<vmem>>, %arg3: memref<32x128xf32, #tpu.memory_space<vmem>>, %arg4: memref<1x128xf32, #tpu.memory_space<vmem>>, %arg5: memref<8x128xf32, #tpu.memory_space<vmem>>, %arg6: memref<32x128xf32, #tpu.memory_space<vmem>>, %arg7: memref<1x128xf32, #tpu.memory_space<vmem>>, %arg8: memref<32x128xf32, #tpu.memory_space<vmem>>, %arg9: memref<32x128xf32, #tpu.memory_space<vmem>>, %arg10: memref<16x16xf32, #tpu.memory_space<vmem>>, %arg11: memref<16x128xf32, #tpu.memory_space<vmem>>, %arg12: memref<16x16xf32, #tpu.memory_space<vmem>>) attributes {dimension_semantics = [], scalar_prefetch = 0 : i64, scratch_operands = 0 : i64, tpu.core_type = #tpu.core_type<tc>} {
    %c0 = arith.constant 0 : index
    %c0_0 = arith.constant 0 : index
    %0 = vector.load %arg3[%c0, %c0_0] : memref<32x128xf32, #tpu.memory_space<vmem>>, vector<32x128xf32>
    %c0_1 = arith.constant 0 : index
    %c0_2 = arith.constant 0 : index
    %1 = vector.load %arg6[%c0_1, %c0_2] : memref<32x128xf32, #tpu.memory_space<vmem>>, vector<32x128xf32>
    %c0_3 = arith.constant 0 : index
    %c0_4 = arith.constant 0 : index
    %2 = vector.load %arg0[%c0_3, %c0_4] : memref<16x8xf32, #tpu.memory_space<vmem>>, vector<16x8xf32>
    %c0_5 = arith.constant 0 : index
    %c0_6 = arith.constant 0 : index
    %3 = vector.load %arg2[%c0_5, %c0_6] : memref<8x128xf32, #tpu.memory_space<vmem>>, vector<8x128xf32>
    %cst = arith.constant dense<0.000000e+00> : vector<16x128xf32>
    %4 = tpu.matmul %2, %3, %cst {dimension_numbers = #tpu.dot_dimension_numbers<[1], [0], [0], [1], [0, 0, 1, 1], [], []>} : vector<16x8xf32>, vector<8x128xf32>, vector<16x128xf32> -> vector<16x128xf32>
    %c0_7 = arith.constant 0 : index
    %c0_8 = arith.constant 0 : index
    %5 = vector.load %arg4[%c0_7, %c0_8] : memref<1x128xf32, #tpu.memory_space<vmem>>, vector<1x128xf32>
    %6 = vector.broadcast %5 : vector<1x128xf32> to vector<16x128xf32>
    %7 = arith.addf %4, %6 : vector<16x128xf32>
    %c0_9 = arith.constant 0 : index
    %c0_10 = arith.constant 0 : index
    %8 = vector.load %arg1[%c0_9, %c0_10] : memref<16x8xf32, #tpu.memory_space<vmem>>, vector<16x8xf32>
    %c0_11 = arith.constant 0 : index
    %c0_12 = arith.constant 0 : index
    %9 = vector.load %arg5[%c0_11, %c0_12] : memref<8x128xf32, #tpu.memory_space<vmem>>, vector<8x128xf32>
    %cst_13 = arith.constant dense<0.000000e+00> : vector<16x128xf32>
    %10 = tpu.matmul %8, %9, %cst_13 {dimension_numbers = #tpu.dot_dimension_numbers<[1], [0], [0], [1], [0, 0, 1, 1], [], []>} : vector<16x8xf32>, vector<8x128xf32>, vector<16x128xf32> -> vector<16x128xf32>
    %c0_14 = arith.constant 0 : index
    %c0_15 = arith.constant 0 : index
    %11 = vector.load %arg7[%c0_14, %c0_15] : memref<1x128xf32, #tpu.memory_space<vmem>>, vector<1x128xf32>
    %12 = vector.broadcast %11 : vector<1x128xf32> to vector<16x128xf32>
    %13 = arith.addf %10, %12 : vector<16x128xf32>
    %cst_16 = arith.constant 0.000000e+00 : f32
    %14 = vector.broadcast %cst_16 : f32 to vector<2x32xf32>
    %cst_17 = arith.constant 0.000000e+00 : f32
    %15 = vector.broadcast %cst_17 : f32 to vector<2x32xf32>
    %16 = vector.extract_strided_slice %7 {offsets = [0, 0], sizes = [2, 128], strides = [1, 1]} : vector<16x128xf32> to vector<2x128xf32>
    %cst_18 = arith.constant dense<0.000000e+00> : vector<2x128xf32>
    %17 = tpu.matmul %14, %0, %cst_18 {dimension_numbers = #tpu.dot_dimension_numbers<[1], [0], [0], [1], [0, 0, 1, 1], [], []>} : vector<2x32xf32>, vector<32x128xf32>, vector<2x128xf32> -> vector<2x128xf32>
    %18 = arith.addf %16, %17 : vector<2x128xf32>
    %19 = arith.negf %18 : vector<2x128xf32>
    %20 = math.exp %19 : vector<2x128xf32>
    %cst_19 = arith.constant 1.000000e+00 : f32
    %21 = vector.broadcast %cst_19 : f32 to vector<2x128xf32>
    %22 = arith.addf %21, %20 : vector<2x128xf32>
    %23 = arith.divf %21, %22 : vector<2x128xf32>
    %24 = vector.extract_strided_slice %23 {offsets = [0, 0], sizes = [2, 32], strides = [1, 1]} : vector<2x128xf32> to vector<2x32xf32>
    %25 = vector.extract_strided_slice %23 {offsets = [0, 32], sizes = [2, 32], strides = [1, 1]} : vector<2x128xf32> to vector<2x32xf32>
    %26 = vector.extract_strided_slice %23 {offsets = [0, 96], sizes = [2, 32], strides = [1, 1]} : vector<2x128xf32> to vector<2x32xf32>
    %27 = vector.extract_strided_slice %18 {offsets = [0, 64], sizes = [2, 32], strides = [1, 1]} : vector<2x128xf32> to vector<2x32xf32>
    %28 = math.tanh %27 : vector<2x32xf32>
    %29 = arith.mulf %25, %15 : vector<2x32xf32>
    %30 = arith.mulf %24, %28 : vector<2x32xf32>
    %31 = arith.addf %29, %30 : vector<2x32xf32>
    %32 = math.tanh %31 : vector<2x32xf32>
    %33 = arith.mulf %26, %32 : vector<2x32xf32>
    %34 = vector.extract_strided_slice %7 {offsets = [2, 0], sizes = [2, 128], strides = [1, 1]} : vector<16x128xf32> to vector<2x128xf32>
    %cst_20 = arith.constant dense<0.000000e+00> : vector<2x128xf32>
    %35 = tpu.matmul %33, %0, %cst_20 {dimension_numbers = #tpu.dot_dimension_numbers<[1], [0], [0], [1], [0, 0, 1, 1], [], []>} : vector<2x32xf32>, vector<32x128xf32>, vector<2x128xf32> -> vector<2x128xf32>
    %36 = arith.addf %34, %35 : vector<2x128xf32>
    %37 = arith.negf %36 : vector<2x128xf32>
    %38 = math.exp %37 : vector<2x128xf32>
    %cst_21 = arith.constant 1.000000e+00 : f32
    %39 = vector.broadcast %cst_21 : f32 to vector<2x128xf32>
    %40 = arith.addf %39, %38 : vector<2x128xf32>
    %41 = arith.divf %39, %40 : vector<2x128xf32>
    %42 = vector.extract_strided_slice %41 {offsets = [0, 0], sizes = [2, 32], strides = [1, 1]} : vector<2x128xf32> to vector<2x32xf32>
    %43 = vector.extract_strided_slice %41 {offsets = [0, 32], sizes = [2, 32], strides = [1, 1]} : vector<2x128xf32> to vector<2x32xf32>
    %44 = vector.extract_strided_slice %41 {offsets = [0, 96], sizes = [2, 32], strides = [1, 1]} : vector<2x128xf32> to vector<2x32xf32>
    %45 = vector.extract_strided_slice %36 {offsets = [0, 64], sizes = [2, 32], strides = [1, 1]} : vector<2x128xf32> to vector<2x32xf32>
    %46 = math.tanh %45 : vector<2x32xf32>
    %47 = arith.mulf %43, %31 : vector<2x32xf32>
    %48 = arith.mulf %42, %46 : vector<2x32xf32>
    %49 = arith.addf %47, %48 : vector<2x32xf32>
    %50 = math.tanh %49 : vector<2x32xf32>
    %51 = arith.mulf %44, %50 : vector<2x32xf32>
    %52 = vector.extract_strided_slice %7 {offsets = [4, 0], sizes = [2, 128], strides = [1, 1]} : vector<16x128xf32> to vector<2x128xf32>
    %cst_22 = arith.constant dense<0.000000e+00> : vector<2x128xf32>
    %53 = tpu.matmul %51, %0, %cst_22 {dimension_numbers = #tpu.dot_dimension_numbers<[1], [0], [0], [1], [0, 0, 1, 1], [], []>} : vector<2x32xf32>, vector<32x128xf32>, vector<2x128xf32> -> vector<2x128xf32>
    %54 = arith.addf %52, %53 : vector<2x128xf32>
    %55 = arith.negf %54 : vector<2x128xf32>
    %56 = math.exp %55 : vector<2x128xf32>
    %cst_23 = arith.constant 1.000000e+00 : f32
    %57 = vector.broadcast %cst_23 : f32 to vector<2x128xf32>
    %58 = arith.addf %57, %56 : vector<2x128xf32>
    %59 = arith.divf %57, %58 : vector<2x128xf32>
    %60 = vector.extract_strided_slice %59 {offsets = [0, 0], sizes = [2, 32], strides = [1, 1]} : vector<2x128xf32> to vector<2x32xf32>
    %61 = vector.extract_strided_slice %59 {offsets = [0, 32], sizes = [2, 32], strides = [1, 1]} : vector<2x128xf32> to vector<2x32xf32>
    %62 = vector.extract_strided_slice %59 {offsets = [0, 96], sizes = [2, 32], strides = [1, 1]} : vector<2x128xf32> to vector<2x32xf32>
    %63 = vector.extract_strided_slice %54 {offsets = [0, 64], sizes = [2, 32], strides = [1, 1]} : vector<2x128xf32> to vector<2x32xf32>
    %64 = math.tanh %63 : vector<2x32xf32>
    %65 = arith.mulf %61, %49 : vector<2x32xf32>
    %66 = arith.mulf %60, %64 : vector<2x32xf32>
    %67 = arith.addf %65, %66 : vector<2x32xf32>
    %68 = math.tanh %67 : vector<2x32xf32>
    %69 = arith.mulf %62, %68 : vector<2x32xf32>
    %70 = vector.extract_strided_slice %7 {offsets = [6, 0], sizes = [2, 128], strides = [1, 1]} : vector<16x128xf32> to vector<2x128xf32>
    %cst_24 = arith.constant dense<0.000000e+00> : vector<2x128xf32>
    %71 = tpu.matmul %69, %0, %cst_24 {dimension_numbers = #tpu.dot_dimension_numbers<[1], [0], [0], [1], [0, 0, 1, 1], [], []>} : vector<2x32xf32>, vector<32x128xf32>, vector<2x128xf32> -> vector<2x128xf32>
    %72 = arith.addf %70, %71 : vector<2x128xf32>
    %73 = arith.negf %72 : vector<2x128xf32>
    %74 = math.exp %73 : vector<2x128xf32>
    %cst_25 = arith.constant 1.000000e+00 : f32
    %75 = vector.broadcast %cst_25 : f32 to vector<2x128xf32>
    %76 = arith.addf %75, %74 : vector<2x128xf32>
    %77 = arith.divf %75, %76 : vector<2x128xf32>
    %78 = vector.extract_strided_slice %77 {offsets = [0, 0], sizes = [2, 32], strides = [1, 1]} : vector<2x128xf32> to vector<2x32xf32>
    %79 = vector.extract_strided_slice %77 {offsets = [0, 32], sizes = [2, 32], strides = [1, 1]} : vector<2x128xf32> to vector<2x32xf32>
    %80 = vector.extract_strided_slice %77 {offsets = [0, 96], sizes = [2, 32], strides = [1, 1]} : vector<2x128xf32> to vector<2x32xf32>
    %81 = vector.extract_strided_slice %72 {offsets = [0, 64], sizes = [2, 32], strides = [1, 1]} : vector<2x128xf32> to vector<2x32xf32>
    %82 = math.tanh %81 : vector<2x32xf32>
    %83 = arith.mulf %79, %67 : vector<2x32xf32>
    %84 = arith.mulf %78, %82 : vector<2x32xf32>
    %85 = arith.addf %83, %84 : vector<2x32xf32>
    %86 = math.tanh %85 : vector<2x32xf32>
    %87 = arith.mulf %80, %86 : vector<2x32xf32>
    %88 = vector.extract_strided_slice %7 {offsets = [8, 0], sizes = [2, 128], strides = [1, 1]} : vector<16x128xf32> to vector<2x128xf32>
    %cst_26 = arith.constant dense<0.000000e+00> : vector<2x128xf32>
    %89 = tpu.matmul %87, %0, %cst_26 {dimension_numbers = #tpu.dot_dimension_numbers<[1], [0], [0], [1], [0, 0, 1, 1], [], []>} : vector<2x32xf32>, vector<32x128xf32>, vector<2x128xf32> -> vector<2x128xf32>
    %90 = arith.addf %88, %89 : vector<2x128xf32>
    %91 = arith.negf %90 : vector<2x128xf32>
    %92 = math.exp %91 : vector<2x128xf32>
    %cst_27 = arith.constant 1.000000e+00 : f32
    %93 = vector.broadcast %cst_27 : f32 to vector<2x128xf32>
    %94 = arith.addf %93, %92 : vector<2x128xf32>
    %95 = arith.divf %93, %94 : vector<2x128xf32>
    %96 = vector.extract_strided_slice %95 {offsets = [0, 0], sizes = [2, 32], strides = [1, 1]} : vector<2x128xf32> to vector<2x32xf32>
    %97 = vector.extract_strided_slice %95 {offsets = [0, 32], sizes = [2, 32], strides = [1, 1]} : vector<2x128xf32> to vector<2x32xf32>
    %98 = vector.extract_strided_slice %95 {offsets = [0, 96], sizes = [2, 32], strides = [1, 1]} : vector<2x128xf32> to vector<2x32xf32>
    %99 = vector.extract_strided_slice %90 {offsets = [0, 64], sizes = [2, 32], strides = [1, 1]} : vector<2x128xf32> to vector<2x32xf32>
    %100 = math.tanh %99 : vector<2x32xf32>
    %101 = arith.mulf %97, %85 : vector<2x32xf32>
    %102 = arith.mulf %96, %100 : vector<2x32xf32>
    %103 = arith.addf %101, %102 : vector<2x32xf32>
    %104 = math.tanh %103 : vector<2x32xf32>
    %105 = arith.mulf %98, %104 : vector<2x32xf32>
    %106 = vector.extract_strided_slice %7 {offsets = [10, 0], sizes = [2, 128], strides = [1, 1]} : vector<16x128xf32> to vector<2x128xf32>
    %cst_28 = arith.constant dense<0.000000e+00> : vector<2x128xf32>
    %107 = tpu.matmul %105, %0, %cst_28 {dimension_numbers = #tpu.dot_dimension_numbers<[1], [0], [0], [1], [0, 0, 1, 1], [], []>} : vector<2x32xf32>, vector<32x128xf32>, vector<2x128xf32> -> vector<2x128xf32>
    %108 = arith.addf %106, %107 : vector<2x128xf32>
    %109 = arith.negf %108 : vector<2x128xf32>
    %110 = math.exp %109 : vector<2x128xf32>
    %cst_29 = arith.constant 1.000000e+00 : f32
    %111 = vector.broadcast %cst_29 : f32 to vector<2x128xf32>
    %112 = arith.addf %111, %110 : vector<2x128xf32>
    %113 = arith.divf %111, %112 : vector<2x128xf32>
    %114 = vector.extract_strided_slice %113 {offsets = [0, 0], sizes = [2, 32], strides = [1, 1]} : vector<2x128xf32> to vector<2x32xf32>
    %115 = vector.extract_strided_slice %113 {offsets = [0, 32], sizes = [2, 32], strides = [1, 1]} : vector<2x128xf32> to vector<2x32xf32>
    %116 = vector.extract_strided_slice %113 {offsets = [0, 96], sizes = [2, 32], strides = [1, 1]} : vector<2x128xf32> to vector<2x32xf32>
    %117 = vector.extract_strided_slice %108 {offsets = [0, 64], sizes = [2, 32], strides = [1, 1]} : vector<2x128xf32> to vector<2x32xf32>
    %118 = math.tanh %117 : vector<2x32xf32>
    %119 = arith.mulf %115, %103 : vector<2x32xf32>
    %120 = arith.mulf %114, %118 : vector<2x32xf32>
    %121 = arith.addf %119, %120 : vector<2x32xf32>
    %122 = math.tanh %121 : vector<2x32xf32>
    %123 = arith.mulf %116, %122 : vector<2x32xf32>
    %124 = vector.extract_strided_slice %7 {offsets = [12, 0], sizes = [2, 128], strides = [1, 1]} : vector<16x128xf32> to vector<2x128xf32>
    %cst_30 = arith.constant dense<0.000000e+00> : vector<2x128xf32>
    %125 = tpu.matmul %123, %0, %cst_30 {dimension_numbers = #tpu.dot_dimension_numbers<[1], [0], [0], [1], [0, 0, 1, 1], [], []>} : vector<2x32xf32>, vector<32x128xf32>, vector<2x128xf32> -> vector<2x128xf32>
    %126 = arith.addf %124, %125 : vector<2x128xf32>
    %127 = arith.negf %126 : vector<2x128xf32>
    %128 = math.exp %127 : vector<2x128xf32>
    %cst_31 = arith.constant 1.000000e+00 : f32
    %129 = vector.broadcast %cst_31 : f32 to vector<2x128xf32>
    %130 = arith.addf %129, %128 : vector<2x128xf32>
    %131 = arith.divf %129, %130 : vector<2x128xf32>
    %132 = vector.extract_strided_slice %131 {offsets = [0, 0], sizes = [2, 32], strides = [1, 1]} : vector<2x128xf32> to vector<2x32xf32>
    %133 = vector.extract_strided_slice %131 {offsets = [0, 32], sizes = [2, 32], strides = [1, 1]} : vector<2x128xf32> to vector<2x32xf32>
    %134 = vector.extract_strided_slice %131 {offsets = [0, 96], sizes = [2, 32], strides = [1, 1]} : vector<2x128xf32> to vector<2x32xf32>
    %135 = vector.extract_strided_slice %126 {offsets = [0, 64], sizes = [2, 32], strides = [1, 1]} : vector<2x128xf32> to vector<2x32xf32>
    %136 = math.tanh %135 : vector<2x32xf32>
    %137 = arith.mulf %133, %121 : vector<2x32xf32>
    %138 = arith.mulf %132, %136 : vector<2x32xf32>
    %139 = arith.addf %137, %138 : vector<2x32xf32>
    %140 = math.tanh %139 : vector<2x32xf32>
    %141 = arith.mulf %134, %140 : vector<2x32xf32>
    %142 = vector.extract_strided_slice %7 {offsets = [14, 0], sizes = [2, 128], strides = [1, 1]} : vector<16x128xf32> to vector<2x128xf32>
    %cst_32 = arith.constant dense<0.000000e+00> : vector<2x128xf32>
    %143 = tpu.matmul %141, %0, %cst_32 {dimension_numbers = #tpu.dot_dimension_numbers<[1], [0], [0], [1], [0, 0, 1, 1], [], []>} : vector<2x32xf32>, vector<32x128xf32>, vector<2x128xf32> -> vector<2x128xf32>
    %144 = arith.addf %142, %143 : vector<2x128xf32>
    %145 = arith.negf %144 : vector<2x128xf32>
    %146 = math.exp %145 : vector<2x128xf32>
    %cst_33 = arith.constant 1.000000e+00 : f32
    %147 = vector.broadcast %cst_33 : f32 to vector<2x128xf32>
    %148 = arith.addf %147, %146 : vector<2x128xf32>
    %149 = arith.divf %147, %148 : vector<2x128xf32>
    %150 = vector.extract_strided_slice %149 {offsets = [0, 0], sizes = [2, 32], strides = [1, 1]} : vector<2x128xf32> to vector<2x32xf32>
    %151 = vector.extract_strided_slice %149 {offsets = [0, 32], sizes = [2, 32], strides = [1, 1]} : vector<2x128xf32> to vector<2x32xf32>
    %152 = vector.extract_strided_slice %149 {offsets = [0, 96], sizes = [2, 32], strides = [1, 1]} : vector<2x128xf32> to vector<2x32xf32>
    %153 = vector.extract_strided_slice %144 {offsets = [0, 64], sizes = [2, 32], strides = [1, 1]} : vector<2x128xf32> to vector<2x32xf32>
    %154 = math.tanh %153 : vector<2x32xf32>
    %155 = arith.mulf %151, %139 : vector<2x32xf32>
    %156 = arith.mulf %150, %154 : vector<2x32xf32>
    %157 = arith.addf %155, %156 : vector<2x32xf32>
    %158 = math.tanh %157 : vector<2x32xf32>
    %159 = arith.mulf %152, %158 : vector<2x32xf32>
    %160 = vector.extract_strided_slice %13 {offsets = [0, 0], sizes = [2, 128], strides = [1, 1]} : vector<16x128xf32> to vector<2x128xf32>
    %cst_34 = arith.constant dense<0.000000e+00> : vector<2x128xf32>
    %161 = tpu.matmul %159, %1, %cst_34 {dimension_numbers = #tpu.dot_dimension_numbers<[1], [0], [0], [1], [0, 0, 1, 1], [], []>} : vector<2x32xf32>, vector<32x128xf32>, vector<2x128xf32> -> vector<2x128xf32>
    %162 = arith.addf %160, %161 : vector<2x128xf32>
    %163 = arith.negf %162 : vector<2x128xf32>
    %164 = math.exp %163 : vector<2x128xf32>
    %cst_35 = arith.constant 1.000000e+00 : f32
    %165 = vector.broadcast %cst_35 : f32 to vector<2x128xf32>
    %166 = arith.addf %165, %164 : vector<2x128xf32>
    %167 = arith.divf %165, %166 : vector<2x128xf32>
    %168 = vector.extract_strided_slice %167 {offsets = [0, 0], sizes = [2, 32], strides = [1, 1]} : vector<2x128xf32> to vector<2x32xf32>
    %169 = vector.extract_strided_slice %167 {offsets = [0, 32], sizes = [2, 32], strides = [1, 1]} : vector<2x128xf32> to vector<2x32xf32>
    %170 = vector.extract_strided_slice %167 {offsets = [0, 96], sizes = [2, 32], strides = [1, 1]} : vector<2x128xf32> to vector<2x32xf32>
    %171 = vector.extract_strided_slice %162 {offsets = [0, 64], sizes = [2, 32], strides = [1, 1]} : vector<2x128xf32> to vector<2x32xf32>
    %172 = math.tanh %171 : vector<2x32xf32>
    %173 = arith.mulf %169, %157 : vector<2x32xf32>
    %174 = arith.mulf %168, %172 : vector<2x32xf32>
    %175 = arith.addf %173, %174 : vector<2x32xf32>
    %176 = math.tanh %175 : vector<2x32xf32>
    %177 = arith.mulf %170, %176 : vector<2x32xf32>
    %178 = vector.extract_strided_slice %13 {offsets = [2, 0], sizes = [2, 128], strides = [1, 1]} : vector<16x128xf32> to vector<2x128xf32>
    %cst_36 = arith.constant dense<0.000000e+00> : vector<2x128xf32>
    %179 = tpu.matmul %177, %1, %cst_36 {dimension_numbers = #tpu.dot_dimension_numbers<[1], [0], [0], [1], [0, 0, 1, 1], [], []>} : vector<2x32xf32>, vector<32x128xf32>, vector<2x128xf32> -> vector<2x128xf32>
    %180 = arith.addf %178, %179 : vector<2x128xf32>
    %181 = arith.negf %180 : vector<2x128xf32>
    %182 = math.exp %181 : vector<2x128xf32>
    %cst_37 = arith.constant 1.000000e+00 : f32
    %183 = vector.broadcast %cst_37 : f32 to vector<2x128xf32>
    %184 = arith.addf %183, %182 : vector<2x128xf32>
    %185 = arith.divf %183, %184 : vector<2x128xf32>
    %186 = vector.extract_strided_slice %185 {offsets = [0, 0], sizes = [2, 32], strides = [1, 1]} : vector<2x128xf32> to vector<2x32xf32>
    %187 = vector.extract_strided_slice %185 {offsets = [0, 32], sizes = [2, 32], strides = [1, 1]} : vector<2x128xf32> to vector<2x32xf32>
    %188 = vector.extract_strided_slice %185 {offsets = [0, 96], sizes = [2, 32], strides = [1, 1]} : vector<2x128xf32> to vector<2x32xf32>
    %189 = vector.extract_strided_slice %180 {offsets = [0, 64], sizes = [2, 32], strides = [1, 1]} : vector<2x128xf32> to vector<2x32xf32>
    %190 = math.tanh %189 : vector<2x32xf32>
    %191 = arith.mulf %187, %175 : vector<2x32xf32>
    %192 = arith.mulf %186, %190 : vector<2x32xf32>
    %193 = arith.addf %191, %192 : vector<2x32xf32>
    %194 = math.tanh %193 : vector<2x32xf32>
    %195 = arith.mulf %188, %194 : vector<2x32xf32>
    %196 = vector.extract_strided_slice %13 {offsets = [4, 0], sizes = [2, 128], strides = [1, 1]} : vector<16x128xf32> to vector<2x128xf32>
    %cst_38 = arith.constant dense<0.000000e+00> : vector<2x128xf32>
    %197 = tpu.matmul %195, %1, %cst_38 {dimension_numbers = #tpu.dot_dimension_numbers<[1], [0], [0], [1], [0, 0, 1, 1], [], []>} : vector<2x32xf32>, vector<32x128xf32>, vector<2x128xf32> -> vector<2x128xf32>
    %198 = arith.addf %196, %197 : vector<2x128xf32>
    %199 = arith.negf %198 : vector<2x128xf32>
    %200 = math.exp %199 : vector<2x128xf32>
    %cst_39 = arith.constant 1.000000e+00 : f32
    %201 = vector.broadcast %cst_39 : f32 to vector<2x128xf32>
    %202 = arith.addf %201, %200 : vector<2x128xf32>
    %203 = arith.divf %201, %202 : vector<2x128xf32>
    %204 = vector.extract_strided_slice %203 {offsets = [0, 0], sizes = [2, 32], strides = [1, 1]} : vector<2x128xf32> to vector<2x32xf32>
    %205 = vector.extract_strided_slice %203 {offsets = [0, 32], sizes = [2, 32], strides = [1, 1]} : vector<2x128xf32> to vector<2x32xf32>
    %206 = vector.extract_strided_slice %203 {offsets = [0, 96], sizes = [2, 32], strides = [1, 1]} : vector<2x128xf32> to vector<2x32xf32>
    %207 = vector.extract_strided_slice %198 {offsets = [0, 64], sizes = [2, 32], strides = [1, 1]} : vector<2x128xf32> to vector<2x32xf32>
    %208 = math.tanh %207 : vector<2x32xf32>
    %209 = arith.mulf %205, %193 : vector<2x32xf32>
    %210 = arith.mulf %204, %208 : vector<2x32xf32>
    %211 = arith.addf %209, %210 : vector<2x32xf32>
    %212 = math.tanh %211 : vector<2x32xf32>
    %213 = arith.mulf %206, %212 : vector<2x32xf32>
    %214 = vector.extract_strided_slice %13 {offsets = [6, 0], sizes = [2, 128], strides = [1, 1]} : vector<16x128xf32> to vector<2x128xf32>
    %cst_40 = arith.constant dense<0.000000e+00> : vector<2x128xf32>
    %215 = tpu.matmul %213, %1, %cst_40 {dimension_numbers = #tpu.dot_dimension_numbers<[1], [0], [0], [1], [0, 0, 1, 1], [], []>} : vector<2x32xf32>, vector<32x128xf32>, vector<2x128xf32> -> vector<2x128xf32>
    %216 = arith.addf %214, %215 : vector<2x128xf32>
    %217 = arith.negf %216 : vector<2x128xf32>
    %218 = math.exp %217 : vector<2x128xf32>
    %cst_41 = arith.constant 1.000000e+00 : f32
    %219 = vector.broadcast %cst_41 : f32 to vector<2x128xf32>
    %220 = arith.addf %219, %218 : vector<2x128xf32>
    %221 = arith.divf %219, %220 : vector<2x128xf32>
    %222 = vector.extract_strided_slice %221 {offsets = [0, 0], sizes = [2, 32], strides = [1, 1]} : vector<2x128xf32> to vector<2x32xf32>
    %223 = vector.extract_strided_slice %221 {offsets = [0, 32], sizes = [2, 32], strides = [1, 1]} : vector<2x128xf32> to vector<2x32xf32>
    %224 = vector.extract_strided_slice %221 {offsets = [0, 96], sizes = [2, 32], strides = [1, 1]} : vector<2x128xf32> to vector<2x32xf32>
    %225 = vector.extract_strided_slice %216 {offsets = [0, 64], sizes = [2, 32], strides = [1, 1]} : vector<2x128xf32> to vector<2x32xf32>
    %226 = math.tanh %225 : vector<2x32xf32>
    %227 = arith.mulf %223, %211 : vector<2x32xf32>
    %228 = arith.mulf %222, %226 : vector<2x32xf32>
    %229 = arith.addf %227, %228 : vector<2x32xf32>
    %230 = math.tanh %229 : vector<2x32xf32>
    %231 = arith.mulf %224, %230 : vector<2x32xf32>
    %232 = vector.extract_strided_slice %13 {offsets = [8, 0], sizes = [2, 128], strides = [1, 1]} : vector<16x128xf32> to vector<2x128xf32>
    %cst_42 = arith.constant dense<0.000000e+00> : vector<2x128xf32>
    %233 = tpu.matmul %231, %1, %cst_42 {dimension_numbers = #tpu.dot_dimension_numbers<[1], [0], [0], [1], [0, 0, 1, 1], [], []>} : vector<2x32xf32>, vector<32x128xf32>, vector<2x128xf32> -> vector<2x128xf32>
    %234 = arith.addf %232, %233 : vector<2x128xf32>
    %235 = arith.negf %234 : vector<2x128xf32>
    %236 = math.exp %235 : vector<2x128xf32>
    %cst_43 = arith.constant 1.000000e+00 : f32
    %237 = vector.broadcast %cst_43 : f32 to vector<2x128xf32>
    %238 = arith.addf %237, %236 : vector<2x128xf32>
    %239 = arith.divf %237, %238 : vector<2x128xf32>
    %240 = vector.extract_strided_slice %239 {offsets = [0, 0], sizes = [2, 32], strides = [1, 1]} : vector<2x128xf32> to vector<2x32xf32>
    %241 = vector.extract_strided_slice %239 {offsets = [0, 32], sizes = [2, 32], strides = [1, 1]} : vector<2x128xf32> to vector<2x32xf32>
    %242 = vector.extract_strided_slice %239 {offsets = [0, 96], sizes = [2, 32], strides = [1, 1]} : vector<2x128xf32> to vector<2x32xf32>
    %243 = vector.extract_strided_slice %234 {offsets = [0, 64], sizes = [2, 32], strides = [1, 1]} : vector<2x128xf32> to vector<2x32xf32>
    %244 = math.tanh %243 : vector<2x32xf32>
    %245 = arith.mulf %241, %229 : vector<2x32xf32>
    %246 = arith.mulf %240, %244 : vector<2x32xf32>
    %247 = arith.addf %245, %246 : vector<2x32xf32>
    %248 = math.tanh %247 : vector<2x32xf32>
    %249 = arith.mulf %242, %248 : vector<2x32xf32>
    %250 = vector.extract_strided_slice %13 {offsets = [10, 0], sizes = [2, 128], strides = [1, 1]} : vector<16x128xf32> to vector<2x128xf32>
    %cst_44 = arith.constant dense<0.000000e+00> : vector<2x128xf32>
    %251 = tpu.matmul %249, %1, %cst_44 {dimension_numbers = #tpu.dot_dimension_numbers<[1], [0], [0], [1], [0, 0, 1, 1], [], []>} : vector<2x32xf32>, vector<32x128xf32>, vector<2x128xf32> -> vector<2x128xf32>
    %252 = arith.addf %250, %251 : vector<2x128xf32>
    %253 = arith.negf %252 : vector<2x128xf32>
    %254 = math.exp %253 : vector<2x128xf32>
    %cst_45 = arith.constant 1.000000e+00 : f32
    %255 = vector.broadcast %cst_45 : f32 to vector<2x128xf32>
    %256 = arith.addf %255, %254 : vector<2x128xf32>
    %257 = arith.divf %255, %256 : vector<2x128xf32>
    %258 = vector.extract_strided_slice %257 {offsets = [0, 0], sizes = [2, 32], strides = [1, 1]} : vector<2x128xf32> to vector<2x32xf32>
    %259 = vector.extract_strided_slice %257 {offsets = [0, 32], sizes = [2, 32], strides = [1, 1]} : vector<2x128xf32> to vector<2x32xf32>
    %260 = vector.extract_strided_slice %257 {offsets = [0, 96], sizes = [2, 32], strides = [1, 1]} : vector<2x128xf32> to vector<2x32xf32>
    %261 = vector.extract_strided_slice %252 {offsets = [0, 64], sizes = [2, 32], strides = [1, 1]} : vector<2x128xf32> to vector<2x32xf32>
    %262 = math.tanh %261 : vector<2x32xf32>
    %263 = arith.mulf %259, %247 : vector<2x32xf32>
    %264 = arith.mulf %258, %262 : vector<2x32xf32>
    %265 = arith.addf %263, %264 : vector<2x32xf32>
    %266 = math.tanh %265 : vector<2x32xf32>
    %267 = arith.mulf %260, %266 : vector<2x32xf32>
    %268 = vector.extract_strided_slice %13 {offsets = [12, 0], sizes = [2, 128], strides = [1, 1]} : vector<16x128xf32> to vector<2x128xf32>
    %cst_46 = arith.constant dense<0.000000e+00> : vector<2x128xf32>
    %269 = tpu.matmul %267, %1, %cst_46 {dimension_numbers = #tpu.dot_dimension_numbers<[1], [0], [0], [1], [0, 0, 1, 1], [], []>} : vector<2x32xf32>, vector<32x128xf32>, vector<2x128xf32> -> vector<2x128xf32>
    %270 = arith.addf %268, %269 : vector<2x128xf32>
    %271 = arith.negf %270 : vector<2x128xf32>
    %272 = math.exp %271 : vector<2x128xf32>
    %cst_47 = arith.constant 1.000000e+00 : f32
    %273 = vector.broadcast %cst_47 : f32 to vector<2x128xf32>
    %274 = arith.addf %273, %272 : vector<2x128xf32>
    %275 = arith.divf %273, %274 : vector<2x128xf32>
    %276 = vector.extract_strided_slice %275 {offsets = [0, 0], sizes = [2, 32], strides = [1, 1]} : vector<2x128xf32> to vector<2x32xf32>
    %277 = vector.extract_strided_slice %275 {offsets = [0, 32], sizes = [2, 32], strides = [1, 1]} : vector<2x128xf32> to vector<2x32xf32>
    %278 = vector.extract_strided_slice %275 {offsets = [0, 96], sizes = [2, 32], strides = [1, 1]} : vector<2x128xf32> to vector<2x32xf32>
    %279 = vector.extract_strided_slice %270 {offsets = [0, 64], sizes = [2, 32], strides = [1, 1]} : vector<2x128xf32> to vector<2x32xf32>
    %280 = math.tanh %279 : vector<2x32xf32>
    %281 = arith.mulf %277, %265 : vector<2x32xf32>
    %282 = arith.mulf %276, %280 : vector<2x32xf32>
    %283 = arith.addf %281, %282 : vector<2x32xf32>
    %284 = math.tanh %283 : vector<2x32xf32>
    %285 = arith.mulf %278, %284 : vector<2x32xf32>
    %286 = vector.extract_strided_slice %13 {offsets = [14, 0], sizes = [2, 128], strides = [1, 1]} : vector<16x128xf32> to vector<2x128xf32>
    %cst_48 = arith.constant dense<0.000000e+00> : vector<2x128xf32>
    %287 = tpu.matmul %285, %1, %cst_48 {dimension_numbers = #tpu.dot_dimension_numbers<[1], [0], [0], [1], [0, 0, 1, 1], [], []>} : vector<2x32xf32>, vector<32x128xf32>, vector<2x128xf32> -> vector<2x128xf32>
    %288 = arith.addf %286, %287 : vector<2x128xf32>
    %289 = arith.negf %288 : vector<2x128xf32>
    %290 = math.exp %289 : vector<2x128xf32>
    %cst_49 = arith.constant 1.000000e+00 : f32
    %291 = vector.broadcast %cst_49 : f32 to vector<2x128xf32>
    %292 = arith.addf %291, %290 : vector<2x128xf32>
    %293 = arith.divf %291, %292 : vector<2x128xf32>
    %294 = vector.extract_strided_slice %293 {offsets = [0, 0], sizes = [2, 32], strides = [1, 1]} : vector<2x128xf32> to vector<2x32xf32>
    %295 = vector.extract_strided_slice %293 {offsets = [0, 32], sizes = [2, 32], strides = [1, 1]} : vector<2x128xf32> to vector<2x32xf32>
    %296 = vector.extract_strided_slice %293 {offsets = [0, 96], sizes = [2, 32], strides = [1, 1]} : vector<2x128xf32> to vector<2x32xf32>
    %297 = vector.extract_strided_slice %288 {offsets = [0, 64], sizes = [2, 32], strides = [1, 1]} : vector<2x128xf32> to vector<2x32xf32>
    %298 = math.tanh %297 : vector<2x32xf32>
    %299 = arith.mulf %295, %283 : vector<2x32xf32>
    %300 = arith.mulf %294, %298 : vector<2x32xf32>
    %301 = arith.addf %299, %300 : vector<2x32xf32>
    %302 = math.tanh %301 : vector<2x32xf32>
    %303 = arith.mulf %296, %302 : vector<2x32xf32>
    %304 = tpu.concatenate %33, %51, %69, %87, %105, %123, %141, %159 in 0 : vector<2x32xf32>, vector<2x32xf32>, vector<2x32xf32>, vector<2x32xf32>, vector<2x32xf32>, vector<2x32xf32>, vector<2x32xf32>, vector<2x32xf32> -> vector<16x32xf32>
    %305 = tpu.concatenate %177, %195, %213, %231, %249, %267, %285, %303 in 0 : vector<2x32xf32>, vector<2x32xf32>, vector<2x32xf32>, vector<2x32xf32>, vector<2x32xf32>, vector<2x32xf32>, vector<2x32xf32>, vector<2x32xf32> -> vector<16x32xf32>
    %cst_50 = arith.constant dense<0.000000e+00> : vector<16x16xf32>
    %306 = tpu.matmul %305, %304, %cst_50 {dimension_numbers = #tpu.dot_dimension_numbers<[1], [1], [0], [0], [0, 0, 1, 0], [], []>} : vector<16x32xf32>, vector<16x32xf32>, vector<16x16xf32> -> vector<16x16xf32>
    %c0_51 = arith.constant 0 : index
    %c0_52 = arith.constant 0 : index
    %307 = vector.load %arg10[%c0_51, %c0_52] : memref<16x16xf32, #tpu.memory_space<vmem>>, vector<16x16xf32>
    %308 = arith.addf %306, %307 : vector<16x16xf32>
    %cst_53 = arith.constant dense<0xFF800000> : vector<16xf32>
    %309 = vector.multi_reduction <maximumf>, %308, %cst_53 [1] : vector<16x16xf32> to vector<16xf32>
    %310 = vector.shape_cast %309 : vector<16xf32> to vector<16x1xf32>
    %311 = vector.broadcast %310 : vector<16x1xf32> to vector<16x16xf32>
    %312 = arith.subf %308, %311 : vector<16x16xf32>
    %313 = math.exp %312 : vector<16x16xf32>
    %cst_54 = arith.constant dense<0.000000e+00> : vector<16xf32>
    %314 = vector.multi_reduction <add>, %313, %cst_54 [1] : vector<16x16xf32> to vector<16xf32>
    %315 = vector.shape_cast %314 : vector<16xf32> to vector<16x1xf32>
    %316 = tpu.reciprocal %315 : vector<16x1xf32> -> vector<16x1xf32>
    %317 = vector.broadcast %316 : vector<16x1xf32> to vector<16x16xf32>
    %318 = arith.mulf %313, %317 : vector<16x16xf32>
    %c0_55 = arith.constant 0 : index
    %c0_56 = arith.constant 0 : index
    %319 = vector.load %arg12[%c0_55, %c0_56] : memref<16x16xf32, #tpu.memory_space<vmem>>, vector<16x16xf32>
    tpu.vector_store %arg12[%c0_55, %c0_56], %318 {strides = array<i32>} : memref<16x16xf32, #tpu.memory_space<vmem>>, vector<16x16xf32>,
    %cst_57 = arith.constant dense<0.000000e+00> : vector<16x32xf32>
    %320 = tpu.matmul %318, %304, %cst_57 {dimension_numbers = #tpu.dot_dimension_numbers<[1], [0], [0], [1], [0, 0, 1, 1], [], []>} : vector<16x16xf32>, vector<16x32xf32>, vector<16x32xf32> -> vector<16x32xf32>
    %c0_58 = arith.constant 0 : index
    %c0_59 = arith.constant 0 : index
    %321 = vector.load %arg8[%c0_58, %c0_59] : memref<32x128xf32, #tpu.memory_space<vmem>>, vector<32x128xf32>
    %cst_60 = arith.constant dense<0.000000e+00> : vector<16x128xf32>
    %322 = tpu.matmul %305, %321, %cst_60 {dimension_numbers = #tpu.dot_dimension_numbers<[1], [0], [0], [1], [0, 0, 1, 1], [], []>} : vector<16x32xf32>, vector<32x128xf32>, vector<16x128xf32> -> vector<16x128xf32>
    %c0_61 = arith.constant 0 : index
    %c0_62 = arith.constant 0 : index
    %323 = vector.load %arg9[%c0_61, %c0_62] : memref<32x128xf32, #tpu.memory_space<vmem>>, vector<32x128xf32>
    %cst_63 = arith.constant dense<0.000000e+00> : vector<16x128xf32>
    %324 = tpu.matmul %320, %323, %cst_63 {dimension_numbers = #tpu.dot_dimension_numbers<[1], [0], [0], [1], [0, 0, 1, 1], [], []>} : vector<16x32xf32>, vector<32x128xf32>, vector<16x128xf32> -> vector<16x128xf32>
    %325 = arith.addf %322, %324 : vector<16x128xf32>
    %c0_64 = arith.constant 0 : index
    %c0_65 = arith.constant 0 : index
    %326 = vector.load %arg11[%c0_64, %c0_65] : memref<16x128xf32, #tpu.memory_space<vmem>>, vector<16x128xf32>
    tpu.vector_store %arg11[%c0_64, %c0_65], %325 {strides = array<i32>} : memref<16x128xf32, #tpu.memory_space<vmem>>, vector<16x128xf32>,
    return
  }
}

</mosaic_0001>

<bundles_post_ra>
// kernel: ger2eng_attention_forward.1
= control target key start
LH: loop header
LB: loop body
LE: loop exit
PB: predicated region body
PF: predicated region fallthrough
CT: control target
= control target key end

     0   :  { %vm58_vm0 = vcmask 64512   ;;  %v2961_v8 = vmov 0.0|0.0   ;;  %vm2962_vm1 = vmmov 0   ;;  %v2963_v10 = vmov 0.0   ;;  %s2964_s16 = smov 64   ;;  %s3406_s2 = inlined_call_operand.vmem [shape: f32[8,128], index: 2, kind: input, shape index: {}]   ;;  %s3407_s0 = inlined_call_operand.vmem [shape: f32[16,8], index: 0, kind: input, shape index: {}]   ;;  %s3408_s3 = inlined_call_operand.vmem [shape: f32[32,128], index: 3, kind: input, shape index: {}]   ;;  %s3409_s4 = inlined_call_operand.vmem [shape: f32[1,128], index: 4, kind: input, shape index: {}]   ;;  %s3410_s5 = inlined_call_operand.vmem [shape: f32[8,128], index: 5, kind: input, shape index: {}]   ;;  %s3411_s1 = inlined_call_operand.vmem [shape: f32[16,8], index: 1, kind: input, shape index: {}]   ;;  %s3412_s7 = inlined_call_operand.vmem [shape: f32[1,128], index: 7, kind: input, shape index: {}]   ;;  %s3413_s6 = inlined_call_operand.vmem [shape: f32[32,128], index: 6, kind: input, shape index: {}]   ;;  %s3414_s10 = inlined_call_operand.vmem [shape: f32[16,16], index: 10, kind: input, shape index: {}]   ;;  %s3415_s9 = inlined_call_operand.vmem [shape: f32[32,128], index: 9, kind: input, shape index: {}]   ;;  %s3416_s12 = inlined_call_operand.vmem [shape: f32[16,16], index: 12, kind: output, shape index: {1}]   ;;  %s3417_s8 = inlined_call_operand.vmem [shape: f32[32,128], index: 8, kind: input, shape index: {}]   ;;  %s3418_s11 = inlined_call_operand.vmem [shape: f32[16,128], index: 11, kind: output, shape index: {0}]  }
   0x1   :  { %v50_v0 = vld [vmem:[%s3406_s2] sm:$0xff]  ;;  %v49_v2 = vld [vmem:[%s3407_s0 + $0x8] sm:$0xff]  ;;  %v42_v5 = vld [vmem:[%s3408_s3 + $0x10] sm:$0xff]  ;;  %vm231_vm2 = vcmask 261120   ;;  %vm1922_vm3 = vcmask 1041408   ;;  %vm1924_vm4 = vcmask 1043456  }
   0x2   :  { %v48_v1 = vld [vmem:[%s3407_s0] sm:$0xff]  ;;  %2469 = vmatprep.subr.mxu0 %v50_v0  ;;  %v41_v4 = vld [vmem:[%s3408_s3 + $0x8] sm:$0xff]  ;;  %v43_v7 = vld [vmem:[%s3408_s3 + $0x18] sm:$0xff]  ;;  %vm1926_vm5 = vcmask 1045504   ;;  %vm2034_vm7 = vcmask 130048  }
   0x3   :  { %2471 = vmatprep.mubr.msk.f32.mxu0 %vm58_vm0, %v48_v1  ;;  %v40_v3 = vld [vmem:[%s3408_s3] sm:$0xff]  ;;  %2470 = vmatpush3.msra.mxu0 %v50_v0  ;;  %v3058_v9 = vpack.c.bf16 %v43_v7, %v42_v5  ;;  %v141_v7 = vld [vmem:[%s3411_s1 + $0x8] sm:$0xff]  ;;  %vm2788_vm6 = vmpackc.low %vm231_vm2, %vm231_vm2 }
   0x4   :  { %v3050_v6 = vpack.c.bf16 %v41_v4, %v40_v3  ;;  %2472 = vmatmul.mubr.msk.f32.vlgmr.msra.gmra.mrb[0].mxu0 %vm58_vm0, %v49_v2  ;;  %2691 = vmatprep.subr.bf16.mxu0 %v2961_v8  ;;  %v2316_v11 = vld [vmem:[%s3409_s4] ss:$0 sm:$0xff]  ;;  %s2965_s4 = smov 32  }
   0x5   :  { %2487 = vmatprep.mubr.msk.f32.mxu0 %vm2962_vm1, %v2963_v10  ;;  %v142_v4 = vld [vmem:[%s3410_s5] sm:$0xff] }
   0x6   :  { %2693 = vmatpush3.bf16.msra.mxu0 %v3050_v6  ;;  %v140_v5 = vld [vmem:[%s3411_s1] sm:$0xff]  ;;  %2474 = vmatprep.subr.mxu1 %v142_v4 }
   0x7   :  { %2694 = vmatprep.subr.bf16.mxu0 %v2961_v8  ;;  %2476 = vmatprep.mubr.msk.f32.mxu1 %vm58_vm0, %v140_v5 }
   0x8   :  { %2475 = vmatpush3.msra.mxu1 %v142_v4 }
   0x9   :  { %2477 = vmatmul.mubr.msk.f32.vlgmr.msra.gmra.mrb[0].mxu1 %vm58_vm0, %v141_v7  ;;  %2709 = vmatprep.subr.bf16.mxu1 %v2961_v8 }
   0xa   :  { %2696 = vmatpush3.bf16.msra.mxu0 %v3058_v9  ;;  %2711 = vmatpush3.bf16.msra.mxu1 %v3050_v6 }
   0xb   :  { %2697 = vmatprep.subr.bf16.mxu0 %v2961_v8  ;;  %2520 = vmatprep.mubr.msk.f32.mxu1 %vm2962_vm1, %v2963_v10 }
   0xc   :  { %2712 = vmatprep.subr.bf16.mxu1 %v2961_v8 }
   0xd   :  { %2488 = vmatmul.mubr.f32.vlgmr.msra.gmra.mrb[2].mxu0 %v2963_v10 }
   0xe   :  { %2699 = vmatpush3.bf16.msra.mxu0 %v3050_v6  ;;  %2498 = vmatprep.mubr.msk.f32.mxu0 %vm2962_vm1, %v2963_v10 }
   0xf   :  { %2700 = vmatprep.subr.bf16.mxu0 %v2961_v8  ;;  %2714 = vmatpush3.bf16.msra.mxu1 %v3058_v9 }
  0x10   :  { %2721 = vmatprep.subr.bf16.mxu1 %v2961_v8 }
  0x12   :  { %2702 = vmatpush3.bf16.msra.mxu0 %v3058_v9 }
  0x13   :  { %2703 = vmatprep.subr.bf16.mxu0 %v2961_v8 }
  0xd7   :  { %v2473_v12 = vpop.f32.mrb[0].mxu0 }
  0xd8   :  { %v3075_v13 = vadd.f32 %v2473_v12, %v2316_v11  ;;  %v131_v14 = vpop.f32.mrb[1].mxu0 }
  0xd9   :  { %v3077_v15 = vadd.f32 %v2316_v11, %v131_v14 }
  0xe0   :  { %v301_v16 = vpop.f32.mrb[2].mxu0 }
  0xe1   :  { %v305_v17 = vadd.f32 %v301_v16, %v3077_v15  ;;  %v2489_v18 = vpop.f32.mrb[3].mxu0 }
  0xe3   :  { %2825 = vtanh.f32 %v305_v17  ;;  %v2322_v20 = vmul.f32 -1.442695, %v305_v17 }
  0xe5   :  { %2827 = vpow2.f32 %v2322_v20  ;;  %v2478_v20 = vpop.f32.mrb[0].mxu1 }
  0xed   :  { %v2826_v19 = vpop.eup %2825 }
  0xee   :  { %315 = vrot.lane.b32.xlu0 %v2826_v19, %s2964_s16  ;;  %v3135_v19 = vld [vmem:[%s3412_s7] ss:$0 sm:$0xff] }
  0xef   :  { %v2828_v21 = vpop.eup %2827 }
  0xf0   :  { %v309_v22 = vadd.f32 1.0, %v2828_v21  ;;  %v3138_v21 = vadd.f32 %v2478_v20, %v3135_v19 }
  0xf2   :  { %2829 = vrcp.f32 %v309_v22  ;;  %v3140_v22 = vpop.f32.mrb[1].mxu1 }
  0xfc   :  { %v2830_v23 = vpop.eup %2829 }
  0xfd   :  { %v313_v26 = vmul.f32 0.0, %v2830_v23 }
 0x160   :  { %v316_v24 = vpop.permute.xlu0 %315 }
 0x161   :  { %v318_v25 = vmul.f32 %v2830_v23, %v316_v24 }
 0x163   :  { %320 = vrot.lane.b32.xlu0 %v318_v25, %s2965_s4 }
 0x1d5   :  { %v321_v27 = vpop.permute.xlu0 %320 }
 0x1d6   :  { %v323_v28 = vadd.f32 %v321_v27, %v313_v26 }
 0x1d8   :  { %2831 = vtanh.f32 %v323_v28  ;;  %v417_v44 = vrot.slane %v323_v28, 6 }
 0x1e2   :  { %v2832_v29 = vpop.eup %2831 }
 0x1e3   :  { %326 = vrot.lane.b32.xlu1 %v2832_v29, %s2964_s16 }
 0x255   :  { %v327_v30 = vpop.permute.xlu1 %326 }
 0x256   :  { %v3083_v31 = vmul.f32 %v2830_v23, %v327_v30 }
 0x258   :  { %331 = vrot.lane.b32.xlu1 %v3083_v31, %s2965_s4 }
 0x2ca   :  { %v332_v32 = vpop.permute.xlu1 %331 }
 0x2cb   :  { %2499 = vmatmul.mubr.msk.f32.vlgmr.msra.gmra.mrb[4].mxu0 %vm231_vm2, %v332_v32 }
 0x2cc   :  { %2705 = vmatpush3.bf16.msra.mxu0 %v3050_v6  ;;  %2509 = vmatprep.mubr.msk.f32.mxu0 %vm2962_vm1, %v2963_v10 }
 0x2cd   :  { %2706 = vmatprep.subr.bf16.mxu0 %v2961_v8 }
 0x2d0   :  { %2708 = vmatpush3.bf16.msra.mxu0 %v3058_v9 }
 0x2d1   :  { %2715 = vmatprep.subr.bf16.mxu0 %v2961_v8 }
 0x39e   :  { %v401_v33 = vpop.f32.mrb[4].mxu0 }
 0x39f   :  { %v406_v34 = vrot.slane %v401_v33, 6  ;;  %v2500_v35 = vpop.f32.mrb[5].mxu0 }
 0x3a1   :  { %v408_v36 = vadd.f32 %v406_v34, %v3077_v15 }
 0x3a3   :  { %2833 = vtanh.f32 %v408_v36  ;;  %v2324_v38 = vmul.f32 -1.442695, %v408_v36 }
 0x3a5   :  { %2835 = vpow2.f32 %v2324_v38 }
 0x3ad   :  { %v2834_v37 = vpop.eup %2833 }
 0x3ae   :  { %421 = vrot.lane.b32.xlu0 %v2834_v37, %s2964_s16 }
 0x3af   :  { %v2836_v39 = vpop.eup %2835 }
 0x3b0   :  { %v412_v40 = vadd.f32 1.0, %v2836_v39 }
 0x3b2   :  { %2837 = vrcp.f32 %v412_v40 }
 0x3bc   :  { %v2838_v41 = vpop.eup %2837 }
 0x3bd   :  { %v419_v45 = vmul.f32 %v2838_v41, %v417_v44 }
 0x420   :  { %v422_v42 = vpop.permute.xlu0 %421 }
 0x421   :  { %v424_v43 = vmul.f32 %v2838_v41, %v422_v42 }
 0x423   :  { %426 = vrot.lane.b32.xlu1 %v424_v43, %s2965_s4 }
 0x495   :  { %v427_v46 = vpop.permute.xlu1 %426 }
 0x496   :  { %v429_v47 = vadd.f32 %v427_v46, %v419_v45 }
 0x498   :  { %2839 = vtanh.f32 %v429_v47  ;;  %v524_v0 = vrot.slane %v429_v47, 6 }
 0x4a2   :  { %v2840_v48 = vpop.eup %2839 }
 0x4a3   :  { %432 = vrot.lane.b32.xlu0 %v2840_v48, %s2964_s16 }
 0x515   :  { %v433_v49 = vpop.permute.xlu0 %432 }
 0x516   :  { %v435_v50 = vmul.f32 %v2838_v41, %v433_v49 }
 0x518   :  { %v437_v51 = vrot.slane %v435_v50, 2  ;;  %v1923_v16 = vsel %vm1922_vm3, %v3083_v31, %v435_v50 }
 0x51a   :  { %438 = vrot.lane.b32.xlu1 %v437_v51, %s2965_s4 }
 0x58c   :  { %v439_v52 = vpop.permute.xlu1 %438 }
 0x58d   :  { %2510 = vmatmul.mubr.msk.f32.vlgmr.msra.gmra.mrb[6].mxu0 %vm231_vm2, %v439_v52 }
 0x58e   :  { %2717 = vmatpush3.bf16.msra.mxu0 %v3050_v6  ;;  %2531 = vmatprep.mubr.msk.f32.mxu0 %vm2962_vm1, %v2963_v10 }
 0x58f   :  { %2718 = vmatprep.subr.bf16.mxu0 %v2961_v8 }
 0x592   :  { %2720 = vmatpush3.bf16.msra.mxu0 %v3058_v9 }
 0x593   :  { %2727 = vmatprep.subr.bf16.mxu0 %v2961_v8 }
 0x660   :  { %v508_v53 = vpop.f32.mrb[6].mxu0 }
 0x661   :  { %v513_v54 = vrot.slane %v508_v53, 4  ;;  %v2511_v55 = vpop.f32.mrb[7].mxu0 }
 0x663   :  { %v515_v56 = vadd.f32 %v513_v54, %v3077_v15 }
 0x665   :  { %2841 = vtanh.f32 %v515_v56  ;;  %v2326_v58 = vmul.f32 -1.442695, %v515_v56 }
 0x667   :  { %2843 = vpow2.f32 %v2326_v58 }
 0x66f   :  { %v2842_v57 = vpop.eup %2841 }
 0x670   :  { %528 = vrot.lane.b32.xlu0 %v2842_v57, %s2964_s16 }
 0x671   :  { %v2844_v59 = vpop.eup %2843 }
 0x672   :  { %v519_v60 = vadd.f32 1.0, %v2844_v59 }
 0x674   :  { %2845 = vrcp.f32 %v519_v60 }
 0x67e   :  { %v2846_v61 = vpop.eup %2845 }
 0x67f   :  { %v526_v1 = vmul.f32 %v2846_v61, %v524_v0 }
 0x6e2   :  { %v529_v62 = vpop.permute.xlu0 %528 }
 0x6e3   :  { %v531_v63 = vmul.f32 %v2846_v61, %v529_v62 }
 0x6e5   :  { %533 = vrot.lane.b32.xlu1 %v531_v63, %s2965_s4 }
 0x757   :  { %v534_v2 = vpop.permute.xlu1 %533 }
 0x758   :  { %v536_v3 = vadd.f32 %v534_v2, %v526_v1 }
 0x75a   :  { %2847 = vtanh.f32 %v536_v3  ;;  %v631_v35 = vrot.slane %v536_v3, 6 }
 0x764   :  { %v2848_v11 = vpop.eup %2847 }
 0x765   :  { %539 = vrot.lane.b32.xlu0 %v2848_v11, %s2964_s16 }
 0x7d7   :  { %v540_v12 = vpop.permute.xlu0 %539 }
 0x7d8   :  { %v542_v14 = vmul.f32 %v2846_v61, %v540_v12 }
 0x7da   :  { %v544_v17 = vrot.slane %v542_v14, 4  ;;  %v1925_v18 = vsel %vm1924_vm4, %v1923_v16, %v542_v14 }
 0x7dc   :  { %545 = vrot.lane.b32.xlu1 %v544_v17, %s2965_s4 }
 0x84e   :  { %v546_v23 = vpop.permute.xlu1 %545 }
 0x84f   :  { %2521 = vmatmul.mubr.msk.f32.vlgmr.msra.gmra.mrb[2].mxu1 %vm231_vm2, %v546_v23 }
 0x850   :  { %2723 = vmatpush3.bf16.msra.mxu1 %v3050_v6  ;;  %2542 = vmatprep.mubr.msk.f32.mxu1 %vm2962_vm1, %v2963_v10 }
 0x851   :  { %2724 = vmatprep.subr.bf16.mxu1 %v2961_v8 }
 0x854   :  { %2726 = vmatpush3.bf16.msra.mxu1 %v3058_v9 }
 0x855   :  { %2733 = vmatprep.subr.bf16.mxu1 %v2961_v8 }
 0x922   :  { %v615_v24 = vpop.f32.mrb[2].mxu1 }
 0x923   :  { %v620_v25 = vrot.slane %v615_v24, 2  ;;  %v2522_v26 = vpop.f32.mrb[3].mxu1 }
 0x925   :  { %v622_v27 = vadd.f32 %v620_v25, %v3077_v15 }
 0x927   :  { %2849 = vtanh.f32 %v622_v27  ;;  %v2328_v29 = vmul.f32 -1.442695, %v622_v27 }
 0x929   :  { %2851 = vpow2.f32 %v2328_v29 }
 0x931   :  { %v2850_v28 = vpop.eup %2849 }
 0x932   :  { %635 = vrot.lane.b32.xlu0 %v2850_v28, %s2964_s16 }
 0x933   :  { %v2852_v30 = vpop.eup %2851 }
 0x934   :  { %v626_v31 = vadd.f32 1.0, %v2852_v30 }
 0x936   :  { %2853 = vrcp.f32 %v626_v31 }
 0x940   :  { %v2854_v32 = vpop.eup %2853 }
 0x941   :  { %v633_v36 = vmul.f32 %v2854_v32, %v631_v35 }
 0x9a4   :  { %v636_v33 = vpop.permute.xlu0 %635 }
 0x9a5   :  { %v638_v34 = vmul.f32 %v2854_v32, %v636_v33 }
 0x9a7   :  { %640 = vrot.lane.b32.xlu1 %v638_v34, %s2965_s4 }
 0xa19   :  { %v641_v37 = vpop.permute.xlu1 %640 }
 0xa1a   :  { %v643_v38 = vadd.f32 %v641_v37, %v633_v36 }
 0xa1c   :  { %2855 = vtanh.f32 %v643_v38  ;;  %v735_v54 = vrot.slane %v643_v38, 6 }
 0xa26   :  { %v2856_v15 = vpop.eup %2855 }
 0xa27   :  { %646 = vrot.lane.b32.xlu0 %v2856_v15, %s2964_s16 }
 0xa99   :  { %v647_v39 = vpop.permute.xlu0 %646 }
 0xa9a   :  { %v649_v40 = vmul.f32 %v2854_v32, %v647_v39 }
 0xa9c   :  { %v651_v41 = vrot.slane %v649_v40, 6  ;;  %v3154_v42 = vsel %vm1926_vm5, %v1925_v18, %v649_v40 }
 0xa9e   :  { %652 = vrot.lane.b32.xlu1 %v651_v41, %s2965_s4 }
 0xb10   :  { %v653_v43 = vpop.permute.xlu1 %652 }
 0xb11   :  { %2532 = vmatmul.mubr.msk.f32.vlgmr.msra.gmra.mrb[8].mxu0 %vm231_vm2, %v653_v43 }
 0xb12   :  { %2729 = vmatpush3.bf16.msra.mxu0 %v3050_v6  ;;  %2553 = vmatprep.mubr.msk.f32.mxu0 %vm2962_vm1, %v2963_v10 }
 0xb13   :  { %2730 = vmatprep.subr.bf16.mxu0 %v2961_v8 }
 0xb16   :  { %2732 = vmatpush3.bf16.msra.mxu0 %v3058_v9 }
 0xb17   :  { %2739 = vmatprep.subr.bf16.mxu0 %v2961_v8 }
 0xbe4   :  { %v722_v44 = vpop.f32.mrb[8].mxu0 }
 0xbe5   :  { %v726_v45 = vadd.f32 %v722_v44, %v3075_v13  ;;  %v2533_v46 = vpop.f32.mrb[9].mxu0 }
 0xbe7   :  { %2857 = vtanh.f32 %v726_v45  ;;  %v2330_v48 = vmul.f32 -1.442695, %v726_v45 }
 0xbe9   :  { %2859 = vpow2.f32 %v2330_v48 }
 0xbf1   :  { %v2858_v47 = vpop.eup %2857 }
 0xbf2   :  { %739 = vrot.lane.b32.xlu0 %v2858_v47, %s2964_s16 }
 0xbf3   :  { %v2860_v49 = vpop.eup %2859 }
 0xbf4   :  { %v730_v50 = vadd.f32 1.0, %v2860_v49 }
 0xbf6   :  { %2861 = vrcp.f32 %v730_v50 }
 0xc00   :  { %v2862_v51 = vpop.eup %2861 }
 0xc01   :  { %v737_v55 = vmul.f32 %v2862_v51, %v735_v54 }
 0xc64   :  { %v740_v52 = vpop.permute.xlu0 %739 }
 0xc65   :  { %v742_v53 = vmul.f32 %v2862_v51, %v740_v52 }
 0xc67   :  { %744 = vrot.lane.b32.xlu1 %v742_v53, %s2965_s4 }
 0xcd9   :  { %v745_v56 = vpop.permute.xlu1 %744 }
 0xcda   :  { %v747_v57 = vadd.f32 %v745_v56, %v737_v55 }
 0xcdc   :  { %2863 = vtanh.f32 %v747_v57 }
 0xce6   :  { %v2864_v58 = vpop.eup %2863 }
 0xce7   :  { %750 = vrot.lane.b32.xlu0 %v2864_v58, %s2964_s16 }
 0xd59   :  { %v751_v59 = vpop.permute.xlu0 %750 }
 0xd5a   :  { %v3168_v60 = vmul.f32 %v2862_v51, %v751_v59 }
 0xd5c   :  { %755 = vrot.lane.b32.xlu1 %v3168_v60, %s2965_s4 }
 0xdce   :  { %v756_v61 = vpop.permute.xlu1 %755 }
 0xdcf   :  { %2543 = vmatmul.mubr.msk.f32.vlgmr.msra.gmra.mrb[4].mxu1 %vm231_vm2, %v756_v61 }
 0xdd0   :  { %2735 = vmatpush3.bf16.msra.mxu1 %v3050_v6  ;;  %2564 = vmatprep.mubr.msk.f32.mxu1 %vm2962_vm1, %v2963_v10 }
 0xdd1   :  { %2736 = vmatprep.subr.bf16.mxu1 %v2961_v8 }
 0xdd4   :  { %2738 = vmatpush3.bf16.msra.mxu1 %v3058_v9  ;;  %v841_v9 = vrot.slane %v747_v57, 6 }
 0xdd5   :  { %2745 = vmatprep.subr.bf16.mxu1 %v2961_v8 }
 0xea2   :  { %v825_v62 = vpop.f32.mrb[4].mxu1 }
 0xea3   :  { %v830_v63 = vrot.slane %v825_v62, 6  ;;  %v2544_v0 = vpop.f32.mrb[5].mxu1  ;;  %v45_v62 = vld [vmem:[%s3413_s6 + $0x8] sm:$0xff] }
 0xea5   :  { %v832_v1 = vadd.f32 %v830_v63, %v3075_v13  ;;  %v46_v63 = vld [vmem:[%s3413_s6 + $0x10] sm:$0xff] }
 0xea7   :  { %2865 = vtanh.f32 %v832_v1  ;;  %v2332_v3 = vmul.f32 -1.442695, %v832_v1  ;;  %v47_v1 = vld [vmem:[%s3413_s6 + $0x18] sm:$0xff] }
 0xea9   :  { %2867 = vpow2.f32 %v2332_v3 }
 0xeb1   :  { %v2866_v2 = vpop.eup %2865 }
 0xeb2   :  { %845 = vrot.lane.b32.xlu0 %v2866_v2, %s2964_s16  ;;  %v3216_v2 = vpack.c.bf16 %v47_v1, %v46_v63 }
 0xeb3   :  { %v2868_v6 = vpop.eup %2867 }
 0xeb4   :  { %v836_v4 = vadd.f32 1.0, %v2868_v6 }
 0xeb6   :  { %2869 = vrcp.f32 %v836_v4 }
 0xec0   :  { %v2870_v5 = vpop.eup %2869 }
 0xec1   :  { %v843_v12 = vmul.f32 %v2870_v5, %v841_v9 }
 0xf24   :  { %v846_v7 = vpop.permute.xlu0 %845 }
 0xf25   :  { %v848_v11 = vmul.f32 %v2870_v5, %v846_v7 }
 0xf27   :  { %850 = vrot.lane.b32.xlu1 %v848_v11, %s2965_s4 }
 0xf99   :  { %v851_v14 = vpop.permute.xlu1 %850 }
 0xf9a   :  { %v853_v16 = vadd.f32 %v851_v14, %v843_v12  ;;  %v3241_v12 = vadd.f32 %v3135_v19, %v3140_v22 }
 0xf9c   :  { %2871 = vtanh.f32 %v853_v16  ;;  %v948_v36 = vrot.slane %v853_v16, 6 }
 0xfa6   :  { %v2872_v17 = vpop.eup %2871 }
 0xfa7   :  { %856 = vrot.lane.b32.xlu0 %v2872_v17, %s2964_s16 }
0x1019   :  { %v857_v18 = vpop.permute.xlu0 %856 }
0x101a   :  { %v859_v20 = vmul.f32 %v2870_v5, %v857_v18 }
0x101c   :  { %v861_v23 = vrot.slane %v859_v20, 2  ;;  %v1928_v43 = vsel %vm1922_vm3, %v3168_v60, %v859_v20 }
0x101e   :  { %862 = vrot.lane.b32.xlu1 %v861_v23, %s2965_s4 }
0x1090   :  { %v863_v24 = vpop.permute.xlu1 %862 }
0x1091   :  { %2554 = vmatmul.mubr.msk.f32.vlgmr.msra.gmra.mrb[10].mxu0 %vm231_vm2, %v863_v24 }
0x1092   :  { %2575 = vmatprep.mubr.msk.f32.mxu0 %vm2962_vm1, %v2963_v10 }
0x1164   :  { %v932_v25 = vpop.f32.mrb[10].mxu0 }
0x1165   :  { %v937_v26 = vrot.slane %v932_v25, 4  ;;  %v2555_v27 = vpop.f32.mrb[11].mxu0 }
0x1167   :  { %v939_v28 = vadd.f32 %v937_v26, %v3075_v13 }
0x1169   :  { %2873 = vtanh.f32 %v939_v28  ;;  %v2334_v30 = vmul.f32 -1.442695, %v939_v28 }
0x116b   :  { %2875 = vpow2.f32 %v2334_v30 }
0x1173   :  { %v2874_v29 = vpop.eup %2873 }
0x1174   :  { %952 = vrot.lane.b32.xlu0 %v2874_v29, %s2964_s16 }
0x1175   :  { %v2876_v31 = vpop.eup %2875 }
0x1176   :  { %v943_v32 = vadd.f32 1.0, %v2876_v31 }
0x1178   :  { %2877 = vrcp.f32 %v943_v32 }
0x1182   :  { %v2878_v33 = vpop.eup %2877 }
0x1183   :  { %v950_v37 = vmul.f32 %v2878_v33, %v948_v36 }
0x11e6   :  { %v953_v34 = vpop.permute.xlu0 %952 }
0x11e7   :  { %v955_v35 = vmul.f32 %v2878_v33, %v953_v34 }
0x11e9   :  { %957 = vrot.lane.b32.xlu1 %v955_v35, %s2965_s4 }
0x125b   :  { %v958_v38 = vpop.permute.xlu1 %957 }
0x125c   :  { %v960_v15 = vadd.f32 %v958_v38, %v950_v37 }
0x125e   :  { %2879 = vtanh.f32 %v960_v15  ;;  %v1055_v58 = vrot.slane %v960_v15, 6 }
0x1268   :  { %v2880_v39 = vpop.eup %2879 }
0x1269   :  { %963 = vrot.lane.b32.xlu0 %v2880_v39, %s2964_s16 }
0x12db   :  { %v964_v40 = vpop.permute.xlu0 %963 }
0x12dc   :  { %v966_v41 = vmul.f32 %v2878_v33, %v964_v40 }
0x12de   :  { %v968_v44 = vrot.slane %v966_v41, 4  ;;  %v1929_v45 = vsel %vm1924_vm4, %v1928_v43, %v966_v41 }
0x12e0   :  { %969 = vrot.lane.b32.xlu1 %v968_v44, %s2965_s4 }
0x1352   :  { %v970_v46 = vpop.permute.xlu1 %969 }
0x1353   :  { %2565 = vmatmul.mubr.msk.f32.vlgmr.msra.gmra.mrb[6].mxu1 %vm231_vm2, %v970_v46 }
0x1354   :  { %2586 = vmatprep.mubr.msk.f32.mxu1 %vm2962_vm1, %v2963_v10 }
0x1426   :  { %v1039_v47 = vpop.f32.mrb[6].mxu1 }
0x1427   :  { %v1044_v48 = vrot.slane %v1039_v47, 2  ;;  %v2566_v49 = vpop.f32.mrb[7].mxu1 }
0x1429   :  { %v1046_v50 = vadd.f32 %v1044_v48, %v3075_v13  ;;  %v44_v13 = vld [vmem:[%s3413_s6] sm:$0xff] }
0x142a   :  { %v3210_v0 = vpack.c.bf16 %v45_v62, %v44_v13 }
0x142b   :  { %2881 = vtanh.f32 %v1046_v50  ;;  %v2336_v52 = vmul.f32 -1.442695, %v1046_v50 }
0x142c   :  { %2741 = vmatpush3.bf16.msra.mxu0 %v3210_v0  ;;  %2747 = vmatpush3.bf16.msra.mxu1 %v3210_v0 }
0x142d   :  { %2883 = vpow2.f32 %v2336_v52  ;;  %2742 = vmatprep.subr.bf16.mxu0 %v2961_v8  ;;  %2748 = vmatprep.subr.bf16.mxu1 %v2961_v8 }
0x1430   :  { %2744 = vmatpush3.bf16.msra.mxu0 %v3216_v2  ;;  %2750 = vmatpush3.bf16.msra.mxu1 %v3216_v2 }
0x1431   :  { %2751 = vmatprep.subr.bf16.mxu0 %v2961_v8  ;;  %2757 = vmatprep.subr.bf16.mxu1 %v2961_v8 }
0x1435   :  { %v2882_v51 = vpop.eup %2881 }
0x1436   :  { %1059 = vrot.lane.b32.xlu0 %v2882_v51, %s2964_s16 }
0x1437   :  { %v2884_v53 = vpop.eup %2883 }
0x1438   :  { %v1050_v54 = vadd.f32 1.0, %v2884_v53 }
0x143a   :  { %2885 = vrcp.f32 %v1050_v54 }
0x1444   :  { %v2886_v55 = vpop.eup %2885 }
0x1445   :  { %v1057_v59 = vmul.f32 %v2886_v55, %v1055_v58 }
0x14a8   :  { %v1060_v56 = vpop.permute.xlu0 %1059 }
0x14a9   :  { %v1062_v57 = vmul.f32 %v2886_v55, %v1060_v56 }
0x14ab   :  { %1064 = vrot.lane.b32.xlu1 %v1062_v57, %s2965_s4 }
0x151d   :  { %v1065_v60 = vpop.permute.xlu1 %1064 }
0x151e   :  { %v1067_v61 = vadd.f32 %v1065_v60, %v1057_v59 }
0x1520   :  { %2887 = vtanh.f32 %v1067_v61  ;;  %v1159_v19 = vrot.slane %v1067_v61, 6 }
0x152a   :  { %v2888_v3 = vpop.eup %2887 }
0x152b   :  { %1070 = vrot.lane.b32.xlu0 %v2888_v3, %s2964_s16 }
0x159d   :  { %v1071_v6 = vpop.permute.xlu0 %1070 }
0x159e   :  { %v1073_v4 = vmul.f32 %v2886_v55, %v1071_v6 }
0x15a0   :  { %v1075_v5 = vrot.slane %v1073_v4, 6  ;;  %v3227_v7 = vsel %vm1926_vm5, %v1929_v45, %v1073_v4 }
0x15a1   :  { %v2820_v11 = vpack.i.bf16 %v3227_v7, %v3154_v42 }
0x15a2   :  { %1076 = vrot.lane.b32.xlu1 %v1075_v5, %s2965_s4 }
0x1614   :  { %v1077_v9 = vpop.permute.xlu1 %1076 }
0x1615   :  { %2576 = vmatmul.mubr.msk.f32.vlgmr.msra.gmra.mrb[12].mxu0 %vm231_vm2, %v1077_v9 }
0x1616   :  { %2753 = vmatpush3.bf16.msra.mxu0 %v3210_v0  ;;  %2597 = vmatprep.mubr.msk.f32.mxu0 %vm2962_vm1, %v2963_v10 }
0x1617   :  { %2754 = vmatprep.subr.bf16.mxu0 %v2961_v8 }
0x161a   :  { %2756 = vmatpush3.bf16.msra.mxu0 %v3216_v2 }
0x161b   :  { %2763 = vmatprep.subr.bf16.mxu0 %v2961_v8 }
0x16e8   :  { %v1146_v14 = vpop.f32.mrb[12].mxu0 }
0x16e9   :  { %v1150_v16 = vadd.f32 %v1146_v14, %v3241_v12  ;;  %v2577_v17 = vpop.f32.mrb[13].mxu0 }
0x16eb   :  { %2889 = vtanh.f32 %v1150_v16  ;;  %v2338_v20 = vmul.f32 -1.442695, %v1150_v16 }
0x16ed   :  { %2891 = vpow2.f32 %v2338_v20 }
0x16f5   :  { %v2890_v18 = vpop.eup %2889 }
0x16f6   :  { %1163 = vrot.lane.b32.xlu0 %v2890_v18, %s2964_s16 }
0x16f7   :  { %v2892_v23 = vpop.eup %2891 }
0x16f8   :  { %v1154_v24 = vadd.f32 1.0, %v2892_v23 }
0x16fa   :  { %2893 = vrcp.f32 %v1154_v24 }
0x1704   :  { %v2894_v25 = vpop.eup %2893 }
0x1705   :  { %v1161_v22 = vmul.f32 %v2894_v25, %v1159_v19 }
0x1768   :  { %v1164_v26 = vpop.permute.xlu0 %1163 }
0x1769   :  { %v1166_v27 = vmul.f32 %v2894_v25, %v1164_v26 }
0x176b   :  { %1168 = vrot.lane.b32.xlu1 %v1166_v27, %s2965_s4 }
0x17dd   :  { %v1169_v28 = vpop.permute.xlu1 %1168 }
0x17de   :  { %v1171_v29 = vadd.f32 %v1169_v28, %v1161_v22 }
0x17e0   :  { %2895 = vtanh.f32 %v1171_v29  ;;  %v1265_v45 = vrot.slane %v1171_v29, 6 }
0x17ea   :  { %v2896_v30 = vpop.eup %2895 }
0x17eb   :  { %1174 = vrot.lane.b32.xlu0 %v2896_v30, %s2964_s16 }
0x185d   :  { %v1175_v31 = vpop.permute.xlu0 %1174 }
0x185e   :  { %v3247_v32 = vmul.f32 %v2894_v25, %v1175_v31 }
0x1860   :  { %1179 = vrot.lane.b32.xlu1 %v3247_v32, %s2965_s4 }
0x18d2   :  { %v1180_v33 = vpop.permute.xlu1 %1179 }
0x18d3   :  { %2587 = vmatmul.mubr.msk.f32.vlgmr.msra.gmra.mrb[8].mxu1 %vm231_vm2, %v1180_v33 }
0x18d4   :  { %2759 = vmatpush3.bf16.msra.mxu1 %v3210_v0  ;;  %2608 = vmatprep.mubr.msk.f32.mxu1 %vm2962_vm1, %v2963_v10 }
0x18d5   :  { %2760 = vmatprep.subr.bf16.mxu1 %v2961_v8 }
0x18d8   :  { %2762 = vmatpush3.bf16.msra.mxu1 %v3216_v2 }
0x18d9   :  { %2769 = vmatprep.subr.bf16.mxu1 %v2961_v8 }
0x19a6   :  { %v1249_v34 = vpop.f32.mrb[8].mxu1 }
0x19a7   :  { %v1254_v35 = vrot.slane %v1249_v34, 6  ;;  %v2588_v36 = vpop.f32.mrb[9].mxu1 }
0x19a9   :  { %v1256_v37 = vadd.f32 %v1254_v35, %v3241_v12 }
0x19ab   :  { %2897 = vtanh.f32 %v1256_v37  ;;  %v2340_v15 = vmul.f32 -1.442695, %v1256_v37 }
0x19ad   :  { %2899 = vpow2.f32 %v2340_v15 }
0x19b5   :  { %v2898_v38 = vpop.eup %2897 }
0x19b6   :  { %1269 = vrot.lane.b32.xlu0 %v2898_v38, %s2964_s16 }
0x19b7   :  { %v2900_v39 = vpop.eup %2899 }
0x19b8   :  { %v1260_v40 = vadd.f32 1.0, %v2900_v39 }
0x19ba   :  { %2901 = vrcp.f32 %v1260_v40 }
0x19c4   :  { %v2902_v41 = vpop.eup %2901 }
0x19c5   :  { %v1267_v46 = vmul.f32 %v2902_v41, %v1265_v45 }
0x1a28   :  { %v1270_v43 = vpop.permute.xlu0 %1269 }
0x1a29   :  { %v1272_v44 = vmul.f32 %v2902_v41, %v1270_v43 }
0x1a2b   :  { %1274 = vrot.lane.b32.xlu1 %v1272_v44, %s2965_s4 }
0x1a9d   :  { %v1275_v47 = vpop.permute.xlu1 %1274 }
0x1a9e   :  { %v1277_v48 = vadd.f32 %v1275_v47, %v1267_v46 }
0x1aa0   :  { %2903 = vtanh.f32 %v1277_v48  ;;  %v1372_v1 = vrot.slane %v1277_v48, 6 }
0x1aaa   :  { %v2904_v49 = vpop.eup %2903 }
0x1aab   :  { %1280 = vrot.lane.b32.xlu0 %v2904_v49, %s2964_s16 }
0x1b1d   :  { %v1281_v50 = vpop.permute.xlu0 %1280 }
0x1b1e   :  { %v1283_v51 = vmul.f32 %v2902_v41, %v1281_v50 }
0x1b20   :  { %v1285_v52 = vrot.slane %v1283_v51, 2  ;;  %v1931_v16 = vsel %vm1922_vm3, %v3247_v32, %v1283_v51 }
0x1b22   :  { %1286 = vrot.lane.b32.xlu1 %v1285_v52, %s2965_s4 }
0x1b94   :  { %v1287_v53 = vpop.permute.xlu1 %1286 }
0x1b95   :  { %2598 = vmatmul.mubr.msk.f32.vlgmr.msra.gmra.mrb[14].mxu0 %vm231_vm2, %v1287_v53 }
0x1b96   :  { %2765 = vmatpush3.bf16.msra.mxu0 %v3210_v0  ;;  %2619 = vmatprep.mubr.msk.f32.mxu0 %vm2962_vm1, %v2963_v10 }
0x1b97   :  { %2766 = vmatprep.subr.bf16.mxu0 %v2961_v8 }
0x1b9a   :  { %2768 = vmatpush3.bf16.msra.mxu0 %v3216_v2 }
0x1b9b   :  { %2775 = vmatprep.subr.bf16.mxu0 %v2961_v8 }
0x1c68   :  { %v1356_v54 = vpop.f32.mrb[14].mxu0 }
0x1c69   :  { %v1361_v55 = vrot.slane %v1356_v54, 4  ;;  %v2599_v56 = vpop.f32.mrb[15].mxu0 }
0x1c6b   :  { %v1363_v57 = vadd.f32 %v1361_v55, %v3241_v12 }
0x1c6d   :  { %2905 = vtanh.f32 %v1363_v57  ;;  %v2342_v59 = vmul.f32 -1.442695, %v1363_v57 }
0x1c6f   :  { %2907 = vpow2.f32 %v2342_v59 }
0x1c77   :  { %v2906_v58 = vpop.eup %2905 }
0x1c78   :  { %1376 = vrot.lane.b32.xlu0 %v2906_v58, %s2964_s16 }
0x1c79   :  { %v2908_v60 = vpop.eup %2907 }
0x1c7a   :  { %v1367_v61 = vadd.f32 1.0, %v2908_v60 }
0x1c7c   :  { %2909 = vrcp.f32 %v1367_v61 }
0x1c86   :  { %v2910_v13 = vpop.eup %2909 }
0x1c87   :  { %v1374_v3 = vmul.f32 %v2910_v13, %v1372_v1 }
0x1cea   :  { %v1377_v62 = vpop.permute.xlu0 %1376 }
0x1ceb   :  { %v1379_v63 = vmul.f32 %v2910_v13, %v1377_v62 }
0x1ced   :  { %1381 = vrot.lane.b32.xlu1 %v1379_v63, %s2965_s4 }
0x1d5f   :  { %v1382_v6 = vpop.permute.xlu1 %1381 }
0x1d60   :  { %v1384_v4 = vadd.f32 %v1382_v6, %v1374_v3 }
0x1d62   :  { %2911 = vtanh.f32 %v1384_v4  ;;  %v1479_v32 = vrot.slane %v1384_v4, 6 }
0x1d6c   :  { %v2912_v5 = vpop.eup %2911 }
0x1d6d   :  { %1387 = vrot.lane.b32.xlu0 %v2912_v5, %s2964_s16 }
0x1ddf   :  { %v1388_v9 = vpop.permute.xlu0 %1387 }
0x1de0   :  { %v1390_v14 = vmul.f32 %v2910_v13, %v1388_v9 }
0x1de2   :  { %v1392_v17 = vrot.slane %v1390_v14, 4  ;;  %v1932_v18 = vsel %vm1924_vm4, %v1931_v16, %v1390_v14 }
0x1de4   :  { %1393 = vrot.lane.b32.xlu1 %v1392_v17, %s2965_s4 }
0x1e56   :  { %v1394_v20 = vpop.permute.xlu1 %1393 }
0x1e57   :  { %2609 = vmatmul.mubr.msk.f32.vlgmr.msra.gmra.mrb[10].mxu1 %vm231_vm2, %v1394_v20 }
0x1e58   :  { %2771 = vmatpush3.bf16.msra.mxu1 %v3210_v0  ;;  %2630 = vmatprep.mubr.msk.f32.mxu1 %vm2962_vm1, %v2963_v10 }
0x1e59   :  { %2772 = vmatprep.subr.bf16.mxu1 %v2961_v8 }
0x1e5c   :  { %2774 = vmatpush3.bf16.msra.mxu1 %v3216_v2 }
0x1e5d   :  { %2781 = vmatprep.subr.bf16.mxu1 %v2961_v8 }
0x1f2a   :  { %v1463_v23 = vpop.f32.mrb[10].mxu1 }
0x1f2b   :  { %v1468_v24 = vrot.slane %v1463_v23, 2  ;;  %v2610_v25 = vpop.f32.mrb[11].mxu1 }
0x1f2d   :  { %v1470_v26 = vadd.f32 %v1468_v24, %v3241_v12 }
0x1f2f   :  { %2913 = vtanh.f32 %v1470_v26  ;;  %v2344_v19 = vmul.f32 -1.442695, %v1470_v26 }
0x1f31   :  { %2915 = vpow2.f32 %v2344_v19 }
0x1f39   :  { %v2914_v27 = vpop.eup %2913 }
0x1f3a   :  { %1483 = vrot.lane.b32.xlu0 %v2914_v27, %s2964_s16 }
0x1f3b   :  { %v2916_v22 = vpop.eup %2915 }
0x1f3c   :  { %v1474_v28 = vadd.f32 1.0, %v2916_v22 }
0x1f3e   :  { %2917 = vrcp.f32 %v1474_v28 }
0x1f48   :  { %v2918_v29 = vpop.eup %2917 }
0x1f49   :  { %v1481_v33 = vmul.f32 %v2918_v29, %v1479_v32 }
0x1fac   :  { %v1484_v30 = vpop.permute.xlu0 %1483 }
0x1fad   :  { %v1486_v31 = vmul.f32 %v2918_v29, %v1484_v30 }
0x1faf   :  { %1488 = vrot.lane.b32.xlu1 %v1486_v31, %s2965_s4 }
0x2021   :  { %v1489_v34 = vpop.permute.xlu1 %1488 }
0x2022   :  { %v1491_v35 = vadd.f32 %v1489_v34, %v1481_v33 }
0x2024   :  { %2919 = vtanh.f32 %v1491_v35  ;;  %v1583_v51 = vrot.slane %v1491_v35, 6 }
0x202e   :  { %v2920_v12 = vpop.eup %2919 }
0x202f   :  { %1494 = vrot.lane.b32.xlu0 %v2920_v12, %s2964_s16 }
0x20a1   :  { %v1495_v36 = vpop.permute.xlu0 %1494 }
0x20a2   :  { %v1497_v37 = vmul.f32 %v2918_v29, %v1495_v36 }
0x20a4   :  { %v1499_v38 = vrot.slane %v1497_v37, 6  ;;  %v3290_v15 = vsel %vm1926_vm5, %v1932_v18, %v1497_v37 }
0x20a6   :  { %1500 = vrot.lane.b32.xlu1 %v1499_v38, %s2965_s4 }
0x2118   :  { %v1501_v39 = vpop.permute.xlu1 %1500 }
0x2119   :  { %2620 = vmatmul.mubr.msk.f32.vlgmr.msra.gmra.mrb[16].mxu0 %vm231_vm2, %v1501_v39 }
0x211a   :  { %2777 = vmatpush3.bf16.msra.mxu0 %v3210_v0  ;;  %2641 = vmatprep.mubr.msk.f32.mxu0 %vm2962_vm1, %v2963_v10 }
0x211b   :  { %2778 = vmatprep.subr.bf16.mxu0 %v2961_v8 }
0x211e   :  { %2780 = vmatpush3.bf16.msra.mxu0 %v3216_v2 }
0x21ec   :  { %v1570_v40 = vpop.f32.mrb[16].mxu0 }
0x21ed   :  { %v1574_v41 = vadd.f32 %v1570_v40, %v3138_v21  ;;  %v2621_v43 = vpop.f32.mrb[17].mxu0 }
0x21ef   :  { %2921 = vtanh.f32 %v1574_v41  ;;  %v2346_v45 = vmul.f32 -1.442695, %v1574_v41 }
0x21f1   :  { %2923 = vpow2.f32 %v2346_v45 }
0x21f9   :  { %v2922_v44 = vpop.eup %2921 }
0x21fa   :  { %1587 = vrot.lane.b32.xlu0 %v2922_v44, %s2964_s16 }
0x21fb   :  { %v2924_v46 = vpop.eup %2923 }
0x21fc   :  { %v1578_v47 = vadd.f32 1.0, %v2924_v46 }
0x21fe   :  { %2925 = vrcp.f32 %v1578_v47 }
0x2208   :  { %v2926_v48 = vpop.eup %2925 }
0x2209   :  { %v1585_v52 = vmul.f32 %v2926_v48, %v1583_v51 }
0x226c   :  { %v1588_v49 = vpop.permute.xlu0 %1587 }
0x226d   :  { %v1590_v50 = vmul.f32 %v2926_v48, %v1588_v49 }
0x226f   :  { %1592 = vrot.lane.b32.xlu1 %v1590_v50, %s2965_s4 }
0x22e1   :  { %v1593_v53 = vpop.permute.xlu1 %1592 }
0x22e2   :  { %v1595_v54 = vadd.f32 %v1593_v53, %v1585_v52 }
0x22e4   :  { %2927 = vtanh.f32 %v1595_v54 }
0x22ee   :  { %v2928_v55 = vpop.eup %2927 }
0x22ef   :  { %1598 = vrot.lane.b32.xlu0 %v2928_v55, %s2964_s16 }
0x2361   :  { %v1599_v56 = vpop.permute.xlu0 %1598 }
0x2362   :  { %v3303_v57 = vmul.f32 %v2926_v48, %v1599_v56 }
0x2364   :  { %1603 = vrot.lane.b32.xlu1 %v3303_v57, %s2965_s4 }
0x23d6   :  { %v1604_v58 = vpop.permute.xlu1 %1603 }
0x23d7   :  { %2631 = vmatmul.mubr.msk.f32.vlgmr.msra.gmra.mrb[12].mxu1 %vm231_vm2, %v1604_v58 }
0x23d8   :  { %2783 = vmatpush3.bf16.msra.mxu1 %v3210_v0  ;;  %2652 = vmatprep.mubr.msk.f32.mxu1 %vm2962_vm1, %v2963_v10 }
0x23d9   :  { %2784 = vmatprep.subr.bf16.mxu1 %v2961_v8  ;;  %v1689_v8 = vrot.slane %v1595_v54, 6 }
0x23dc   :  { %2786 = vmatpush3.bf16.msra.mxu1 %v3216_v2 }
0x24aa   :  { %v1673_v59 = vpop.f32.mrb[12].mxu1 }
0x24ab   :  { %v1678_v60 = vrot.slane %v1673_v59, 6  ;;  %v2632_v61 = vpop.f32.mrb[13].mxu1 }
0x24ad   :  { %v1680_v13 = vadd.f32 %v1678_v60, %v3138_v21 }
0x24af   :  { %2929 = vtanh.f32 %v1680_v13  ;;  %v2348_v63 = vmul.f32 -1.442695, %v1680_v13 }
0x24b1   :  { %2931 = vpow2.f32 %v2348_v63 }
0x24b9   :  { %v2930_v62 = vpop.eup %2929 }
0x24ba   :  { %1693 = vrot.lane.b32.xlu0 %v2930_v62, %s2964_s16  ;;  %v1937_v62 = vld [vmem:[%s3414_s10] sm:$0xff] }
0x24bb   :  { %v2932_v1 = vpop.eup %2931 }
0x24bc   :  { %v1684_v0 = vadd.f32 1.0, %v2932_v1 }
0x24be   :  { %2933 = vrcp.f32 %v1684_v0 }
0x24c8   :  { %v2934_v3 = vpop.eup %2933 }
0x24c9   :  { %v1691_v2 = vmul.f32 %v2934_v3, %v1689_v8 }
0x252c   :  { %v1694_v10 = vpop.permute.xlu0 %1693 }
0x252d   :  { %v1696_v6 = vmul.f32 %v2934_v3, %v1694_v10 }
0x252f   :  { %1698 = vrot.lane.b32.xlu1 %v1696_v6, %s2965_s4 }
0x25a1   :  { %v1699_v4 = vpop.permute.xlu1 %1698 }
0x25a2   :  { %v1701_v5 = vadd.f32 %v1699_v4, %v1691_v2 }
0x25a4   :  { %2935 = vtanh.f32 %v1701_v5  ;;  %v1796_v31 = vrot.slane %v1701_v5, 6 }
0x25ae   :  { %v2936_v9 = vpop.eup %2935 }
0x25af   :  { %1704 = vrot.lane.b32.xlu0 %v2936_v9, %s2964_s16 }
0x2621   :  { %v1705_v14 = vpop.permute.xlu0 %1704 }
0x2622   :  { %v1707_v16 = vmul.f32 %v2934_v3, %v1705_v14 }
0x2624   :  { %v1709_v17 = vrot.slane %v1707_v16, 2  ;;  %v1934_v37 = vsel %vm1922_vm3, %v3303_v57, %v1707_v16 }
0x2626   :  { %1710 = vrot.lane.b32.xlu1 %v1709_v17, %s2965_s4 }
0x2698   :  { %v1711_v18 = vpop.permute.xlu1 %1710 }
0x2699   :  { %2642 = vmatmul.mubr.msk.f32.vlgmr.msra.gmra.mrb[18].mxu0 %vm231_vm2, %v1711_v18 }
0x276c   :  { %v1780_v20 = vpop.f32.mrb[18].mxu0 }
0x276d   :  { %v1785_v23 = vrot.slane %v1780_v20, 4  ;;  %v2643_v24 = vpop.f32.mrb[19].mxu0 }
0x276e   :  { %v2147_v24 = vld [vmem:[%s3415_s9 + $0x8] sm:$0xff] }
0x276f   :  { %v1787_v25 = vadd.f32 %v1785_v23, %v3138_v21  ;;  %v2146_v23 = vld [vmem:[%s3415_s9] sm:$0xff] }
0x2771   :  { %2937 = vtanh.f32 %v1787_v25  ;;  %v2350_v27 = vmul.f32 -1.442695, %v1787_v25  ;;  %v2797_v25 = vpack.c.bf16 %v2147_v24, %v2146_v23 }
0x2773   :  { %2939 = vpow2.f32 %v2350_v27 }
0x277b   :  { %v2938_v26 = vpop.eup %2937 }
0x277c   :  { %1800 = vrot.lane.b32.xlu0 %v2938_v26, %s2964_s16 }
0x277d   :  { %v2940_v19 = vpop.eup %2939 }
0x277e   :  { %v1791_v22 = vadd.f32 1.0, %v2940_v19 }
0x2780   :  { %2941 = vrcp.f32 %v1791_v22 }
0x278a   :  { %v2942_v28 = vpop.eup %2941 }
0x278b   :  { %v1798_v32 = vmul.f32 %v2942_v28, %v1796_v31 }
0x27ee   :  { %v1801_v29 = vpop.permute.xlu0 %1800 }
0x27ef   :  { %v1803_v30 = vmul.f32 %v2942_v28, %v1801_v29  ;;  %v2149_v29 = vld [vmem:[%s3415_s9 + $0x18] sm:$0xff] }
0x27f1   :  { %1805 = vrot.lane.b32.xlu1 %v1803_v30, %s2965_s4 }
0x2863   :  { %v1806_v33 = vpop.permute.xlu1 %1805 }
0x2864   :  { %v1808_v34 = vadd.f32 %v1806_v33, %v1798_v32  ;;  %v2142_v33 = vld [vmem:[%s3417_s8] sm:$0xff] }
0x2866   :  { %2943 = vtanh.f32 %v1808_v34 }
0x2870   :  { %v2944_v35 = vpop.eup %2943 }
0x2871   :  { %1811 = vrot.lane.b32.xlu0 %v2944_v35, %s2964_s16 }
0x28e3   :  { %v1812_v12 = vpop.permute.xlu0 %1811 }
0x28e4   :  { %v1814_v36 = vmul.f32 %v2942_v28, %v1812_v12  ;;  %v2148_v28 = vld [vmem:[%s3415_s9 + $0x10] sm:$0xff] }
0x28e5   :  { %v2801_v32 = vpack.c.bf16 %v2149_v29, %v2148_v28  ;;  %v2144_v12 = vld [vmem:[%s3417_s8 + $0x10] sm:$0xff] }
0x28e6   :  { %v1816_v38 = vrot.slane %v1814_v36, 4  ;;  %v1935_v39 = vsel %vm1924_vm4, %v1934_v37, %v1814_v36  ;;  %v2145_v36 = vld [vmem:[%s3417_s8 + $0x18] sm:$0xff] }
0x28e8   :  { %1817 = vrot.lane.b32.xlu1 %v1816_v38, %s2965_s4 }
0x295a   :  { %v1818_v40 = vpop.permute.xlu1 %1817 }
0x295b   :  { %2653 = vmatmul.mubr.msk.f32.vlgmr.msra.gmra.mrb[14].mxu1 %vm231_vm2, %v1818_v40 }
0x2a2e   :  { %v1887_v41 = vpop.f32.mrb[14].mxu1 }
0x2a2f   :  { %v1892_v43 = vrot.slane %v1887_v41, 2  ;;  %v2654_v44 = vpop.f32.mrb[15].mxu1 }
0x2a31   :  { %v1894_v45 = vadd.f32 %v1892_v43, %v3138_v21  ;;  %v1903_v21 = vrot.slane %v1808_v34, 6  ;;  %v2143_v34 = vld [vmem:[%s3417_s8 + $0x8] sm:$0xff] }
0x2a32   :  { %v2805_v35 = vpack.c.bf16 %v2143_v34, %v2142_v33 }
0x2a33   :  { %2945 = vtanh.f32 %v1894_v45  ;;  %v2352_v47 = vmul.f32 -1.442695, %v1894_v45 }
0x2a35   :  { %2947 = vpow2.f32 %v2352_v47 }
0x2a3d   :  { %v2946_v46 = vpop.eup %2945 }
0x2a3e   :  { %1907 = vrot.lane.b32.xlu0 %v2946_v46, %s2964_s16 }
0x2a3f   :  { %v2948_v48 = vpop.eup %2947 }
0x2a40   :  { %v1898_v49 = vadd.f32 1.0, %v2948_v48 }
0x2a42   :  { %2949 = vrcp.f32 %v1898_v49 }
0x2a4c   :  { %v2950_v50 = vpop.eup %2949 }
0x2a4d   :  { %v1905_v53 = vmul.f32 %v2950_v50, %v1903_v21 }
0x2ab0   :  { %v1908_v51 = vpop.permute.xlu0 %1907 }
0x2ab1   :  { %v1910_v52 = vmul.f32 %v2950_v50, %v1908_v51 }
0x2ab3   :  { %1912 = vrot.lane.b32.xlu1 %v1910_v52, %s2965_s4 }
0x2ab7   :  { %2821 = vrot.lane.b32.xlu1 %v2820_v11, %s2965_s4 }
0x2b25   :  { %v1913_v54 = vpop.permute.xlu1 %1912 }
0x2b26   :  { %v1915_v55 = vadd.f32 %v1913_v54, %v1905_v53 }
0x2b28   :  { %2951 = vtanh.f32 %v1915_v55 }
0x2b29   :  { %v2822_v56 = vpop.permute.xlu1 %2821 }
0x2b2a   :  { %v2824_v57 = vunpack.i.h.bf16 %v2822_v56  ;;  %v2823_v58 = vunpack.i.l.bf16 %v2822_v56 }
0x2b2c   :  { %v2787_v59 = vpack.c.bf16 %v2824_v57, %v2823_v58 }
0x2b2e   :  { %2789 = vmatprep.subr.msk.bf16.mxu0 %vm2788_vm6, %v2787_v59  ;;  %2794 = vmatprep.subr.bf16.mxu1 %v2787_v59 }
0x2b2f   :  { %2792 = vmatpush3.bf16.xpose.msk.msra.mxu0 %vm2788_vm6, %v2787_v59  ;;  %2796 = vmatpush3.bf16.msra.mxu1 %v2787_v59 }
0x2b30   :  { %2798 = vmatprep.subr.bf16.mxu1 %v2797_v25 }
0x2b32   :  { %v2952_v60 = vpop.eup %2951 }
0x2b33   :  { %1918 = vrot.lane.b32.xlu0 %v2952_v60, %s2964_s16 }
0x2b37   :  { %1941 = vrot.lane.b32.xlu0 %v3290_v15, %s2965_s4  ;;  %v1938_v15 = vld [vmem:[%s3414_s10 + $0x8] sm:$0xff] }
0x2ba5   :  { %v1919_v42 = vpop.permute.xlu0 %1918 }
0x2ba6   :  { %v1921_v7 = vmul.f32 %v2950_v50, %v1919_v42 }
0x2ba8   :  { %v1936_v11 = vsel %vm1926_vm5, %v1935_v39, %v1921_v7  ;;  %v2809_v39 = vpack.c.bf16 %v2145_v36, %v2144_v12 }
0x2ba9   :  { %1943 = vrot.lane.b32.xlu1 %v1936_v11, %s2965_s4  ;;  %v3342_v61 = vpop.permute.xlu0 %1941 }
0x2baa   :  { %2659 = vmatprep.mubr.msk.f32.mxu0 %vm231_vm2, %v3342_v61 }
0x2c1b   :  { %v3346_v13 = vpop.permute.xlu1 %1943 }
0x2c1c   :  { %2660 = vmatmul.mubr.msk.f32.vlgmr.msra.gmra.mrb[20].mxu0 %vm231_vm2, %v3346_v13 }
0x2cef   :  { %v2661_v63 = vpop.f32.mrb[20].mxu0 }
0x2cf0   :  { %v2031_v1 = vadd.f32 %v2661_v63, %v1938_v15  ;;  %v2025_v0 = vpop.f32.mrb[21].mxu0 }
0x2cf1   :  { %v2026_v3 = vadd.f32 %v2025_v0, %v1937_v62 }
0x2cf2   :  { %v2038_v10 = vsel %vm2034_vm7, %v2031_v1, -inf }
0x2cf3   :  { %2039 = vmax.xlane.f32.xlu1 %v2038_v10  ;;  %v2035_v6 = vsel %vm2034_vm7, %v2026_v3, -inf }
0x2cf4   :  { %2036 = vmax.xlane.f32.xlu0 %v2035_v6 }
0x2d80   :  { %v2040_v8 = vpop.xlane.xlu1 %2039 }
0x2d81   :  { %v2042_v2 = vsub.f32 %v2031_v1, %v2040_v8  ;;  %v2037_v4 = vpop.xlane.xlu0 %2036 }
0x2d82   :  { %v2041_v5 = vsub.f32 %v2026_v3, %v2037_v4 }
0x2d83   :  { %v2045_v9 = vmul.f32 1.442695, %v2042_v2 }
0x2d84   :  { %v2043_v14 = vmul.f32 1.442695, %v2041_v5 }
0x2d86   :  { %2953 = vpow2.f32 %v2043_v14 }
0x2d87   :  { %2955 = vpow2.f32 %v2045_v9 }
0x2d90   :  { %v2954_v16 = vpop.eup %2953 }
0x2d91   :  { %v2047_v17 = vsel %vm2034_vm7, %v2954_v16, 0.0  ;;  %v2956_v18 = vpop.eup %2955 }
0x2d92   :  { %2048 = vadd.xlane.f32.xlu0 %v2047_v17  ;;  %v2050_v20 = vsel %vm2034_vm7, %v2956_v18, 0.0 }
0x2d96   :  { %2051 = vadd.xlane.f32.xlu0 %v2050_v20 }
0x2e1f   :  { %v2049_v26 = vpop.xlane.xlu0 %2048 }
0x2e20   :  { %2957 = vrcp.f32 %v2049_v26 }
0x2e23   :  { %v2052_v27 = vpop.xlane.xlu0 %2051 }
0x2e24   :  { %2959 = vrcp.f32 %v2052_v27 }
0x2e2a   :  { %v2958_v19 = vpop.eup %2957 }
0x2e2b   :  { %v2055_v22 = vmul.f32 %v2958_v19, %v2954_v16 }
0x2e2d   :  { %2057 = vst.msk [vmem:[%s3416_s12] sm:$0xff] %vm2034_vm7, %v2055_v22  ;;  %2666 = vmatprep.mubr.msk.f32.mxu1 %vm2034_vm7, %v2055_v22 }
0x2e2e   :  { %v2960_v30 = vpop.eup %2959 }
0x2e2f   :  { %v2056_v31 = vmul.f32 %v2960_v30, %v2956_v18 }
0x2e31   :  { %2058 = vst.msk [vmem:[%s3416_s12 + $0x8] sm:$0xff] %vm2034_vm7, %v2056_v31  ;;  %2667 = vmatmul.mubr.msk.f32.vlgmr.msra.gmra.mrb[16].mxu1 %vm2034_vm7, %v2056_v31 }
0x2e32   :  { %2800 = vmatpush3.bf16.msra.mxu1 %v2797_v25 }
0x2e33   :  { %2802 = vmatprep.subr.bf16.mxu1 %v2801_v32 }
0x2e36   :  { %2804 = vmatpush3.bf16.msra.mxu1 %v2801_v32 }
0x2e37   :  { %2806 = vmatprep.subr.bf16.mxu1 %v2805_v35 }
0x2f04   :  { %v2668_v37 = vpop.f32.mrb[16].mxu1 }
0x2f05   :  { %v2133_v38 = vpop.f32.mrb[17].mxu1 }
0x2f06   :  { %2677 = vmatprep.mubr.msk.f32.mxu1 %vm231_vm2, %v2133_v38 }
0x2f07   :  { %2678 = vmatmul.mubr.msk.f32.vlgmr.msra.gmra.mrb[18].mxu1 %vm231_vm2, %v2668_v37 }
0x2f08   :  { %2808 = vmatpush3.bf16.msra.mxu1 %v2805_v35  ;;  %2688 = vmatprep.mubr.msk.f32.mxu1 %vm231_vm2, %v3342_v61 }
0x2f09   :  { %2810 = vmatprep.subr.bf16.mxu1 %v2809_v39 }
0x2f0c   :  { %2812 = vmatpush3.bf16.msra.mxu1 %v2809_v39 }
0x2f0f   :  { %2689 = vmatmul.mubr.msk.f32.vlgmr.msra.gmra.mrb[18].mxu1 %vm231_vm2, %v3346_v13 }
0x2fe2   :  { %v2690_v40 = vpop.f32.mrb[18].mxu1 }
0x2fe3   :  { %2307 = vst [vmem:[%s3418_s11 + $0x8] sm:$0xff] %v2690_v40  ;;  %v2297_v41 = vpop.f32.mrb[19].mxu1 }
0x2fe4   :  { %2306 = vst [vmem:[%s3418_s11] sm:$0xff] %v2297_v41 }

</bundles_post_ra>
